<compile_context>
chip_gen: v7x
topology: tpu7x:2x2x1
jax: 0.10.0
libtpu: 0.0.40
codegen_flags: <defaults>
</compile_context>

<pallas_src>
import math

import jax
import jax.numpy as jnp
from jax.experimental import pallas as pl
from jax.experimental.pallas import tpu as pltpu

# ----------------------------- config (cfg) -----------------------------------
B = 2          # batch
S = 8          # sequence length (decoder & encoder)
D_MODEL = 32
D_FF = 64
N_HEADS = 4
D_HEAD = D_MODEL // N_HEADS
EPSILON = 1e-6
DROPOUT = 0.0  # eval mode

M = B * S      # flattened token count


# ----------------------------- fused kernel ------------------------------------
def _decoder_layer_kernel(
    x_ref, enc_ref,
    # masked self-attention (fused QKV) + LN1
    m_wqkv_ref, m_bqkv_ref, m_wo_ref, m_bo_ref, ln1_g_ref, ln1_b_ref,
    # cross attention (fused QK from enc, V from x) + LN2
    c_wqk_ref, c_bqk_ref, c_wv_ref, c_bv_ref, c_wo_ref, c_bo_ref, ln2_g_ref, ln2_b_ref,
    # feed-forward + LN3
    f_w1_ref, f_b1_ref, f_w2_ref, f_b2_ref, ln3_g_ref, ln3_b_ref,
    # output + scratch
    o_ref, ctx_scr,
):
    scale = 1.0 / math.sqrt(D_HEAD)

    x2 = x_ref[...]          # (M, D_MODEL)
    enc2 = enc_ref[...]      # (M, D_MODEL)

    # Causal mask built once and reused for every (batch, head) pair
    # (hoisted out of the per-head loop -> no repeated iota/compare work).
    row = jax.lax.broadcasted_iota(jnp.int32, (S, S), 0)
    col = jax.lax.broadcasted_iota(jnp.int32, (S, S), 1)
    causal_mask = row >= col

    def layer_norm(y, g_ref, b_ref):
        mu = jnp.mean(y, axis=-1, keepdims=True)
        var = jnp.mean((y - mu) * (y - mu), axis=-1, keepdims=True)
        return (y - mu) * jax.lax.rsqrt(var + EPSILON) * g_ref[...] + b_ref[...]

    def mha(q2, k2, v2, wo_ref, bo_ref, causal):
        """q2/k2/v2: (M, D_MODEL) already projected; all B*H heads in one body."""
        for b in range(B):
            r0 = b * S
            for h in range(N_HEADS):
                c0 = h * D_HEAD
                qh = q2[r0:r0 + S, c0:c0 + D_HEAD]          # (S, dk)
                kh = k2[r0:r0 + S, c0:c0 + D_HEAD]
                vh = v2[r0:r0 + S, c0:c0 + D_HEAD]
                # q @ k^T via dot_general contracting last axes (no explicit
                # transpose op ahead of the MXU push).
                s = jax.lax.dot_general(
                    qh, kh, (((1,), (1,)), ((), ())),
                    preferred_element_type=jnp.float32) * scale
                if causal:
                    s = jnp.where(causal_mask, s, jnp.float32(-1e9))
                mmax = jnp.max(s, axis=-1, keepdims=True)
                p = jnp.exp(s - mmax)
                # EUP reciprocal instead of a VALU divide chain.
                p = p * pl.reciprocal(jnp.sum(p, axis=-1, keepdims=True), approx=True)
                ctx_scr[r0:r0 + S, c0:c0 + D_HEAD] = jnp.dot(
                    p, vh, preferred_element_type=jnp.float32)
        ctx = ctx_scr[...]
        return jnp.dot(ctx, wo_ref[...], preferred_element_type=jnp.float32) + bo_ref[...]

    # ---- masked (causal) self-attention: fused QKV matmul -> per-head core -> LN1
    qkv = jnp.dot(x2, m_wqkv_ref[...], preferred_element_type=jnp.float32) + m_bqkv_ref[...]
    q = qkv[:, 0:D_MODEL]
    k = qkv[:, D_MODEL:2 * D_MODEL]
    v = qkv[:, 2 * D_MODEL:3 * D_MODEL]
    attn = mha(q, k, v, m_wo_ref, m_bo_ref, causal=True)
    x1 = layer_norm(attn + x2, ln1_g_ref, ln1_b_ref)

    # ---- cross attention exactly as in the PyTorch forward: q=enc, k=enc, v=x
    qk = jnp.dot(enc2, c_wqk_ref[...], preferred_element_type=jnp.float32) + c_bqk_ref[...]
    q = qk[:, 0:D_MODEL]
    k = qk[:, D_MODEL:2 * D_MODEL]
    v = jnp.dot(x1, c_wv_ref[...], preferred_element_type=jnp.float32) + c_bv_ref[...]
    attn = mha(q, k, v, c_wo_ref, c_bo_ref, causal=False)
    x2b = layer_norm(attn + x1, ln2_g_ref, ln2_b_ref)

    # ---- feed-forward: linear -> relu -> (dropout = identity) -> linear, then LN3
    hdn = jnp.dot(x2b, f_w1_ref[...], preferred_element_type=jnp.float32) + f_b1_ref[...]
    hdn = jnp.maximum(hdn, 0.0)
    # TODO(synk): dropout treated as eval-mode identity.
    y = jnp.dot(hdn, f_w2_ref[...], preferred_element_type=jnp.float32) + f_b2_ref[...]
    o_ref[...] = layer_norm(y + x2b, ln3_g_ref, ln3_b_ref).astype(o_ref.dtype)


# ----------------------------- wrapper ------------------------------------------
@jax.jit
def decoder_layer(x, encoder_output, params):
    # Contiguous (B,S,D)->(B*S,D) reshapes at the call boundary are free views.
    x2 = x.reshape(M, D_MODEL)
    enc2 = encoder_output.reshape(M, D_MODEL)

    args = (
        x2, enc2,
        params["m_wqkv"], params["m_bqkv"], params["m_wo"], params["m_bo"],
        params["ln1_g"], params["ln1_b"],
        params["c_wqk"], params["c_bqk"], params["c_wv"], params["c_bv"],
        params["c_wo"], params["c_bo"], params["ln2_g"], params["ln2_b"],
        params["f_w1"], params["f_b1"], params["f_w2"], params["f_b2"],
        params["ln3_g"], params["ln3_b"],
    )
    vmem_spec = pl.BlockSpec(memory_space=pltpu.MemorySpace.VMEM)

    out = pl.pallas_call(
        _decoder_layer_kernel,
        out_shape=jax.ShapeDtypeStruct((M, D_MODEL), jnp.float32),
        in_specs=[vmem_spec] * len(args),
        out_specs=vmem_spec,
        scratch_shapes=[pltpu.VMEM((M, D_MODEL), jnp.float32)],  # attention context buffer
        compiler_params=pltpu.CompilerParams(vmem_limit_bytes=32 * 1024 * 1024),
    )(*args)
    return out.reshape(B, S, D_MODEL)


# ----------------------------- parameter init -----------------------------------
def init_params(key):
    def lin(k, din, dout):
        kw, kb = jax.random.split(k)
        return (jax.random.normal(kw, (din, dout), jnp.float32) * 0.05,
                jax.random.normal(kb, (1, dout), jnp.float32) * 0.01)

    keys = jax.random.split(key, 10)

    # masked self-attention: separate q/k/v init, fused into one (D, 3D) weight
    wq, bq = lin(keys[0], D_MODEL, D_MODEL)
    wk, bk = lin(keys[1], D_MODEL, D_MODEL)
    wv, bv = lin(keys[2], D_MODEL, D_MODEL)
    wo, bo = lin(keys[3], D_MODEL, D_MODEL)
    m = dict(
        m_wqkv=jnp.concatenate([wq, wk, wv], axis=1),
        m_bqkv=jnp.concatenate([bq, bk, bv], axis=1),
        m_wo=wo, m_bo=bo,
    )

    # cross attention: q,k from encoder (fused QK), v from x
    wq, bq = lin(keys[4], D_MODEL, D_MODEL)
    wk, bk = lin(keys[5], D_MODEL, D_MODEL)
    wv, bv = lin(keys[6], D_MODEL, D_MODEL)
    wo, bo = lin(keys[7], D_MODEL, D_MODEL)
    c = dict(
        c_wqk=jnp.concatenate([wq, wk], axis=1),
        c_bqk=jnp.concatenate([bq, bk], axis=1),
        c_wv=wv, c_bv=bv, c_wo=wo, c_bo=bo,
    )

    w1, b1 = lin(keys[8], D_MODEL, D_FF)
    w2, b2 = lin(keys[9], D_FF, D_MODEL)

    return {
        **m, **c,
        "f_w1": w1, "f_b1": b1, "f_w2": w2, "f_b2": b2,
        "ln1_g": jnp.ones((1, D_MODEL), jnp.float32),
        "ln1_b": jnp.zeros((1, D_MODEL), jnp.float32),
        "ln2_g": jnp.ones((1, D_MODEL), jnp.float32),
        "ln2_b": jnp.zeros((1, D_MODEL), jnp.float32),
        "ln3_g": jnp.ones((1, D_MODEL), jnp.float32),
        "ln3_b": jnp.zeros((1, D_MODEL), jnp.float32),
    }


# ----------------------------- main ---------------------------------------------
if __name__ == "__main__":
    key = jax.random.PRNGKey(0)
    k_x, k_enc, k_p = jax.random.split(key, 3)

    x = jax.random.normal(k_x, (B, S, D_MODEL), jnp.float32)
    encoder_output = jax.random.normal(k_enc, (B, S, D_MODEL), jnp.float32)
    params = init_params(k_p)

    out = decoder_layer(x, encoder_output, params)
    out = jax.block_until_ready(out)
    assert out.shape == (B, S, D_MODEL) and out.dtype == jnp.float32
    assert bool(jnp.all(jnp.isfinite(out)))
    print("KERNEL_OK")
</pallas_src>

<mosaic_0001>
module attributes {stable_mosaic.version = 11 : i64} {
  func.func @_decoder_layer_kernel(%arg0: memref<16x32xf32, #tpu.memory_space<vmem>>, %arg1: memref<16x32xf32, #tpu.memory_space<vmem>>, %arg2: memref<32x96xf32, #tpu.memory_space<vmem>>, %arg3: memref<1x96xf32, #tpu.memory_space<vmem>>, %arg4: memref<32x32xf32, #tpu.memory_space<vmem>>, %arg5: memref<1x32xf32, #tpu.memory_space<vmem>>, %arg6: memref<1x32xf32, #tpu.memory_space<vmem>>, %arg7: memref<1x32xf32, #tpu.memory_space<vmem>>, %arg8: memref<32x64xf32, #tpu.memory_space<vmem>>, %arg9: memref<1x64xf32, #tpu.memory_space<vmem>>, %arg10: memref<32x32xf32, #tpu.memory_space<vmem>>, %arg11: memref<1x32xf32, #tpu.memory_space<vmem>>, %arg12: memref<32x32xf32, #tpu.memory_space<vmem>>, %arg13: memref<1x32xf32, #tpu.memory_space<vmem>>, %arg14: memref<1x32xf32, #tpu.memory_space<vmem>>, %arg15: memref<1x32xf32, #tpu.memory_space<vmem>>, %arg16: memref<32x64xf32, #tpu.memory_space<vmem>>, %arg17: memref<1x64xf32, #tpu.memory_space<vmem>>, %arg18: memref<64x32xf32, #tpu.memory_space<vmem>>, %arg19: memref<1x32xf32, #tpu.memory_space<vmem>>, %arg20: memref<1x32xf32, #tpu.memory_space<vmem>>, %arg21: memref<1x32xf32, #tpu.memory_space<vmem>>, %arg22: memref<16x32xf32, #tpu.memory_space<vmem>>, %arg23: memref<16x32xf32, #tpu.memory_space<vmem>>) attributes {dimension_semantics = [], scalar_prefetch = 0 : i64, scratch_operands = 1 : i64, tpu.core_type = #tpu.core_type<tc>} {
    %c0 = arith.constant 0 : index
    %c0_0 = arith.constant 0 : index
    %0 = vector.load %arg0[%c0, %c0_0] : memref<16x32xf32, #tpu.memory_space<vmem>>, vector<16x32xf32>
    %c0_1 = arith.constant 0 : index
    %c0_2 = arith.constant 0 : index
    %1 = vector.load %arg1[%c0_1, %c0_2] : memref<16x32xf32, #tpu.memory_space<vmem>>, vector<16x32xf32>
    %2 = tpu.iota {dimensions = array<i32: 0>} : vector<8x8xi32>
    %3 = tpu.iota {dimensions = array<i32: 1>} : vector<8x8xi32>
    %4 = arith.cmpi sge, %2, %3 : vector<8x8xi32>
    %c0_3 = arith.constant 0 : index
    %c0_4 = arith.constant 0 : index
    %5 = vector.load %arg2[%c0_3, %c0_4] : memref<32x96xf32, #tpu.memory_space<vmem>>, vector<32x96xf32>
    %cst = arith.constant dense<0.000000e+00> : vector<16x96xf32>
    %6 = tpu.matmul %0, %5, %cst {dimension_numbers = #tpu.dot_dimension_numbers<[1], [0], [0], [1], [0, 0, 1, 1], [], []>} : vector<16x32xf32>, vector<32x96xf32>, vector<16x96xf32> -> vector<16x96xf32>
    %c0_5 = arith.constant 0 : index
    %c0_6 = arith.constant 0 : index
    %7 = vector.load %arg3[%c0_5, %c0_6] : memref<1x96xf32, #tpu.memory_space<vmem>>, vector<1x96xf32>
    %8 = vector.broadcast %7 : vector<1x96xf32> to vector<16x96xf32>
    %9 = arith.addf %6, %8 : vector<16x96xf32>
    %10 = vector.extract_strided_slice %9 {offsets = [0, 0], sizes = [16, 32], strides = [1, 1]} : vector<16x96xf32> to vector<16x32xf32>
    %11 = vector.extract_strided_slice %9 {offsets = [0, 32], sizes = [16, 32], strides = [1, 1]} : vector<16x96xf32> to vector<16x32xf32>
    %12 = vector.extract_strided_slice %9 {offsets = [0, 64], sizes = [16, 32], strides = [1, 1]} : vector<16x96xf32> to vector<16x32xf32>
    %13 = vector.extract_strided_slice %10 {offsets = [0, 0], sizes = [8, 8], strides = [1, 1]} : vector<16x32xf32> to vector<8x8xf32>
    %14 = vector.extract_strided_slice %11 {offsets = [0, 0], sizes = [8, 8], strides = [1, 1]} : vector<16x32xf32> to vector<8x8xf32>
    %15 = vector.extract_strided_slice %12 {offsets = [0, 0], sizes = [8, 8], strides = [1, 1]} : vector<16x32xf32> to vector<8x8xf32>
    %cst_7 = arith.constant dense<0.000000e+00> : vector<8x8xf32>
    %16 = tpu.matmul %13, %14, %cst_7 {dimension_numbers = #tpu.dot_dimension_numbers<[1], [1], [0], [0], [0, 0, 1, 0], [], []>} : vector<8x8xf32>, vector<8x8xf32>, vector<8x8xf32> -> vector<8x8xf32>
    %cst_8 = arith.constant 0.353553385 : f32
    %17 = vector.broadcast %cst_8 : f32 to vector<8x8xf32>
    %18 = arith.mulf %16, %17 : vector<8x8xf32>
    %cst_9 = arith.constant -1.000000e+09 : f32
    %19 = vector.broadcast %cst_9 : f32 to vector<8x8xf32>
    %20 = arith.select %4, %18, %19 : vector<8x8xi1>, vector<8x8xf32>
    %cst_10 = arith.constant dense<0xFF800000> : vector<8xf32>
    %21 = vector.multi_reduction <maximumf>, %20, %cst_10 [1] : vector<8x8xf32> to vector<8xf32>
    %22 = vector.shape_cast %21 : vector<8xf32> to vector<8x1xf32>
    %23 = vector.broadcast %22 : vector<8x1xf32> to vector<8x8xf32>
    %24 = arith.subf %20, %23 : vector<8x8xf32>
    %25 = math.exp %24 : vector<8x8xf32>
    %cst_11 = arith.constant dense<0.000000e+00> : vector<8xf32>
    %26 = vector.multi_reduction <add>, %25, %cst_11 [1] : vector<8x8xf32> to vector<8xf32>
    %27 = vector.shape_cast %26 : vector<8xf32> to vector<8x1xf32>
    %28 = tpu.reciprocal %27 {approx = true} : vector<8x1xf32> -> vector<8x1xf32>
    %29 = vector.broadcast %28 : vector<8x1xf32> to vector<8x8xf32>
    %30 = arith.mulf %25, %29 : vector<8x8xf32>
    %cst_12 = arith.constant dense<0.000000e+00> : vector<8x8xf32>
    %31 = tpu.matmul %30, %15, %cst_12 {dimension_numbers = #tpu.dot_dimension_numbers<[1], [0], [0], [1], [0, 0, 1, 1], [], []>} : vector<8x8xf32>, vector<8x8xf32>, vector<8x8xf32> -> vector<8x8xf32>
    %c0_13 = arith.constant 0 : index
    %c0_14 = arith.constant 0 : index
    %32 = vector.load %arg23[%c0_13, %c0_14] : memref<16x32xf32, #tpu.memory_space<vmem>>, vector<8x8xf32>
    tpu.vector_store %arg23[%c0_13, %c0_14], %31 {strides = array<i32>} : memref<16x32xf32, #tpu.memory_space<vmem>>, vector<8x8xf32>,
    %33 = vector.extract_strided_slice %10 {offsets = [0, 8], sizes = [8, 8], strides = [1, 1]} : vector<16x32xf32> to vector<8x8xf32>
    %34 = vector.extract_strided_slice %11 {offsets = [0, 8], sizes = [8, 8], strides = [1, 1]} : vector<16x32xf32> to vector<8x8xf32>
    %35 = vector.extract_strided_slice %12 {offsets = [0, 8], sizes = [8, 8], strides = [1, 1]} : vector<16x32xf32> to vector<8x8xf32>
    %cst_15 = arith.constant dense<0.000000e+00> : vector<8x8xf32>
    %36 = tpu.matmul %33, %34, %cst_15 {dimension_numbers = #tpu.dot_dimension_numbers<[1], [1], [0], [0], [0, 0, 1, 0], [], []>} : vector<8x8xf32>, vector<8x8xf32>, vector<8x8xf32> -> vector<8x8xf32>
    %cst_16 = arith.constant 0.353553385 : f32
    %37 = vector.broadcast %cst_16 : f32 to vector<8x8xf32>
    %38 = arith.mulf %36, %37 : vector<8x8xf32>
    %cst_17 = arith.constant -1.000000e+09 : f32
    %39 = vector.broadcast %cst_17 : f32 to vector<8x8xf32>
    %40 = arith.select %4, %38, %39 : vector<8x8xi1>, vector<8x8xf32>
    %cst_18 = arith.constant dense<0xFF800000> : vector<8xf32>
    %41 = vector.multi_reduction <maximumf>, %40, %cst_18 [1] : vector<8x8xf32> to vector<8xf32>
    %42 = vector.shape_cast %41 : vector<8xf32> to vector<8x1xf32>
    %43 = vector.broadcast %42 : vector<8x1xf32> to vector<8x8xf32>
    %44 = arith.subf %40, %43 : vector<8x8xf32>
    %45 = math.exp %44 : vector<8x8xf32>
    %cst_19 = arith.constant dense<0.000000e+00> : vector<8xf32>
    %46 = vector.multi_reduction <add>, %45, %cst_19 [1] : vector<8x8xf32> to vector<8xf32>
    %47 = vector.shape_cast %46 : vector<8xf32> to vector<8x1xf32>
    %48 = tpu.reciprocal %47 {approx = true} : vector<8x1xf32> -> vector<8x1xf32>
    %49 = vector.broadcast %48 : vector<8x1xf32> to vector<8x8xf32>
    %50 = arith.mulf %45, %49 : vector<8x8xf32>
    %cst_20 = arith.constant dense<0.000000e+00> : vector<8x8xf32>
    %51 = tpu.matmul %50, %35, %cst_20 {dimension_numbers = #tpu.dot_dimension_numbers<[1], [0], [0], [1], [0, 0, 1, 1], [], []>} : vector<8x8xf32>, vector<8x8xf32>, vector<8x8xf32> -> vector<8x8xf32>
    %c0_21 = arith.constant 0 : index
    %c8 = arith.constant 8 : index
    %52 = vector.load %arg23[%c0_21, %c8] : memref<16x32xf32, #tpu.memory_space<vmem>>, vector<8x8xf32>
    tpu.vector_store %arg23[%c0_21, %c8], %51 {strides = array<i32>} : memref<16x32xf32, #tpu.memory_space<vmem>>, vector<8x8xf32>,
    %53 = vector.extract_strided_slice %10 {offsets = [0, 16], sizes = [8, 8], strides = [1, 1]} : vector<16x32xf32> to vector<8x8xf32>
    %54 = vector.extract_strided_slice %11 {offsets = [0, 16], sizes = [8, 8], strides = [1, 1]} : vector<16x32xf32> to vector<8x8xf32>
    %55 = vector.extract_strided_slice %12 {offsets = [0, 16], sizes = [8, 8], strides = [1, 1]} : vector<16x32xf32> to vector<8x8xf32>
    %cst_22 = arith.constant dense<0.000000e+00> : vector<8x8xf32>
    %56 = tpu.matmul %53, %54, %cst_22 {dimension_numbers = #tpu.dot_dimension_numbers<[1], [1], [0], [0], [0, 0, 1, 0], [], []>} : vector<8x8xf32>, vector<8x8xf32>, vector<8x8xf32> -> vector<8x8xf32>
    %cst_23 = arith.constant 0.353553385 : f32
    %57 = vector.broadcast %cst_23 : f32 to vector<8x8xf32>
    %58 = arith.mulf %56, %57 : vector<8x8xf32>
    %cst_24 = arith.constant -1.000000e+09 : f32
    %59 = vector.broadcast %cst_24 : f32 to vector<8x8xf32>
    %60 = arith.select %4, %58, %59 : vector<8x8xi1>, vector<8x8xf32>
    %cst_25 = arith.constant dense<0xFF800000> : vector<8xf32>
    %61 = vector.multi_reduction <maximumf>, %60, %cst_25 [1] : vector<8x8xf32> to vector<8xf32>
    %62 = vector.shape_cast %61 : vector<8xf32> to vector<8x1xf32>
    %63 = vector.broadcast %62 : vector<8x1xf32> to vector<8x8xf32>
    %64 = arith.subf %60, %63 : vector<8x8xf32>
    %65 = math.exp %64 : vector<8x8xf32>
    %cst_26 = arith.constant dense<0.000000e+00> : vector<8xf32>
    %66 = vector.multi_reduction <add>, %65, %cst_26 [1] : vector<8x8xf32> to vector<8xf32>
    %67 = vector.shape_cast %66 : vector<8xf32> to vector<8x1xf32>
    %68 = tpu.reciprocal %67 {approx = true} : vector<8x1xf32> -> vector<8x1xf32>
    %69 = vector.broadcast %68 : vector<8x1xf32> to vector<8x8xf32>
    %70 = arith.mulf %65, %69 : vector<8x8xf32>
    %cst_27 = arith.constant dense<0.000000e+00> : vector<8x8xf32>
    %71 = tpu.matmul %70, %55, %cst_27 {dimension_numbers = #tpu.dot_dimension_numbers<[1], [0], [0], [1], [0, 0, 1, 1], [], []>} : vector<8x8xf32>, vector<8x8xf32>, vector<8x8xf32> -> vector<8x8xf32>
    %c0_28 = arith.constant 0 : index
    %c16 = arith.constant 16 : index
    %72 = vector.load %arg23[%c0_28, %c16] : memref<16x32xf32, #tpu.memory_space<vmem>>, vector<8x8xf32>
    tpu.vector_store %arg23[%c0_28, %c16], %71 {strides = array<i32>} : memref<16x32xf32, #tpu.memory_space<vmem>>, vector<8x8xf32>,
    %73 = vector.extract_strided_slice %10 {offsets = [0, 24], sizes = [8, 8], strides = [1, 1]} : vector<16x32xf32> to vector<8x8xf32>
    %74 = vector.extract_strided_slice %11 {offsets = [0, 24], sizes = [8, 8], strides = [1, 1]} : vector<16x32xf32> to vector<8x8xf32>
    %75 = vector.extract_strided_slice %12 {offsets = [0, 24], sizes = [8, 8], strides = [1, 1]} : vector<16x32xf32> to vector<8x8xf32>
    %cst_29 = arith.constant dense<0.000000e+00> : vector<8x8xf32>
    %76 = tpu.matmul %73, %74, %cst_29 {dimension_numbers = #tpu.dot_dimension_numbers<[1], [1], [0], [0], [0, 0, 1, 0], [], []>} : vector<8x8xf32>, vector<8x8xf32>, vector<8x8xf32> -> vector<8x8xf32>
    %cst_30 = arith.constant 0.353553385 : f32
    %77 = vector.broadcast %cst_30 : f32 to vector<8x8xf32>
    %78 = arith.mulf %76, %77 : vector<8x8xf32>
    %cst_31 = arith.constant -1.000000e+09 : f32
    %79 = vector.broadcast %cst_31 : f32 to vector<8x8xf32>
    %80 = arith.select %4, %78, %79 : vector<8x8xi1>, vector<8x8xf32>
    %cst_32 = arith.constant dense<0xFF800000> : vector<8xf32>
    %81 = vector.multi_reduction <maximumf>, %80, %cst_32 [1] : vector<8x8xf32> to vector<8xf32>
    %82 = vector.shape_cast %81 : vector<8xf32> to vector<8x1xf32>
    %83 = vector.broadcast %82 : vector<8x1xf32> to vector<8x8xf32>
    %84 = arith.subf %80, %83 : vector<8x8xf32>
    %85 = math.exp %84 : vector<8x8xf32>
    %cst_33 = arith.constant dense<0.000000e+00> : vector<8xf32>
    %86 = vector.multi_reduction <add>, %85, %cst_33 [1] : vector<8x8xf32> to vector<8xf32>
    %87 = vector.shape_cast %86 : vector<8xf32> to vector<8x1xf32>
    %88 = tpu.reciprocal %87 {approx = true} : vector<8x1xf32> -> vector<8x1xf32>
    %89 = vector.broadcast %88 : vector<8x1xf32> to vector<8x8xf32>
    %90 = arith.mulf %85, %89 : vector<8x8xf32>
    %cst_34 = arith.constant dense<0.000000e+00> : vector<8x8xf32>
    %91 = tpu.matmul %90, %75, %cst_34 {dimension_numbers = #tpu.dot_dimension_numbers<[1], [0], [0], [1], [0, 0, 1, 1], [], []>} : vector<8x8xf32>, vector<8x8xf32>, vector<8x8xf32> -> vector<8x8xf32>
    %c0_35 = arith.constant 0 : index
    %c24 = arith.constant 24 : index
    %92 = vector.load %arg23[%c0_35, %c24] : memref<16x32xf32, #tpu.memory_space<vmem>>, vector<8x8xf32>
    tpu.vector_store %arg23[%c0_35, %c24], %91 {strides = array<i32>} : memref<16x32xf32, #tpu.memory_space<vmem>>, vector<8x8xf32>,
    %93 = vector.extract_strided_slice %10 {offsets = [8, 0], sizes = [8, 8], strides = [1, 1]} : vector<16x32xf32> to vector<8x8xf32>
    %94 = vector.extract_strided_slice %11 {offsets = [8, 0], sizes = [8, 8], strides = [1, 1]} : vector<16x32xf32> to vector<8x8xf32>
    %95 = vector.extract_strided_slice %12 {offsets = [8, 0], sizes = [8, 8], strides = [1, 1]} : vector<16x32xf32> to vector<8x8xf32>
    %cst_36 = arith.constant dense<0.000000e+00> : vector<8x8xf32>
    %96 = tpu.matmul %93, %94, %cst_36 {dimension_numbers = #tpu.dot_dimension_numbers<[1], [1], [0], [0], [0, 0, 1, 0], [], []>} : vector<8x8xf32>, vector<8x8xf32>, vector<8x8xf32> -> vector<8x8xf32>
    %cst_37 = arith.constant 0.353553385 : f32
    %97 = vector.broadcast %cst_37 : f32 to vector<8x8xf32>
    %98 = arith.mulf %96, %97 : vector<8x8xf32>
    %cst_38 = arith.constant -1.000000e+09 : f32
    %99 = vector.broadcast %cst_38 : f32 to vector<8x8xf32>
    %100 = arith.select %4, %98, %99 : vector<8x8xi1>, vector<8x8xf32>
    %cst_39 = arith.constant dense<0xFF800000> : vector<8xf32>
    %101 = vector.multi_reduction <maximumf>, %100, %cst_39 [1] : vector<8x8xf32> to vector<8xf32>
    %102 = vector.shape_cast %101 : vector<8xf32> to vector<8x1xf32>
    %103 = vector.broadcast %102 : vector<8x1xf32> to vector<8x8xf32>
    %104 = arith.subf %100, %103 : vector<8x8xf32>
    %105 = math.exp %104 : vector<8x8xf32>
    %cst_40 = arith.constant dense<0.000000e+00> : vector<8xf32>
    %106 = vector.multi_reduction <add>, %105, %cst_40 [1] : vector<8x8xf32> to vector<8xf32>
    %107 = vector.shape_cast %106 : vector<8xf32> to vector<8x1xf32>
    %108 = tpu.reciprocal %107 {approx = true} : vector<8x1xf32> -> vector<8x1xf32>
    %109 = vector.broadcast %108 : vector<8x1xf32> to vector<8x8xf32>
    %110 = arith.mulf %105, %109 : vector<8x8xf32>
    %cst_41 = arith.constant dense<0.000000e+00> : vector<8x8xf32>
    %111 = tpu.matmul %110, %95, %cst_41 {dimension_numbers = #tpu.dot_dimension_numbers<[1], [0], [0], [1], [0, 0, 1, 1], [], []>} : vector<8x8xf32>, vector<8x8xf32>, vector<8x8xf32> -> vector<8x8xf32>
    %c8_42 = arith.constant 8 : index
    %c0_43 = arith.constant 0 : index
    %112 = vector.load %arg23[%c8_42, %c0_43] : memref<16x32xf32, #tpu.memory_space<vmem>>, vector<8x8xf32>
    tpu.vector_store %arg23[%c8_42, %c0_43], %111 {strides = array<i32>} : memref<16x32xf32, #tpu.memory_space<vmem>>, vector<8x8xf32>,
    %113 = vector.extract_strided_slice %10 {offsets = [8, 8], sizes = [8, 8], strides = [1, 1]} : vector<16x32xf32> to vector<8x8xf32>
    %114 = vector.extract_strided_slice %11 {offsets = [8, 8], sizes = [8, 8], strides = [1, 1]} : vector<16x32xf32> to vector<8x8xf32>
    %115 = vector.extract_strided_slice %12 {offsets = [8, 8], sizes = [8, 8], strides = [1, 1]} : vector<16x32xf32> to vector<8x8xf32>
    %cst_44 = arith.constant dense<0.000000e+00> : vector<8x8xf32>
    %116 = tpu.matmul %113, %114, %cst_44 {dimension_numbers = #tpu.dot_dimension_numbers<[1], [1], [0], [0], [0, 0, 1, 0], [], []>} : vector<8x8xf32>, vector<8x8xf32>, vector<8x8xf32> -> vector<8x8xf32>
    %cst_45 = arith.constant 0.353553385 : f32
    %117 = vector.broadcast %cst_45 : f32 to vector<8x8xf32>
    %118 = arith.mulf %116, %117 : vector<8x8xf32>
    %cst_46 = arith.constant -1.000000e+09 : f32
    %119 = vector.broadcast %cst_46 : f32 to vector<8x8xf32>
    %120 = arith.select %4, %118, %119 : vector<8x8xi1>, vector<8x8xf32>
    %cst_47 = arith.constant dense<0xFF800000> : vector<8xf32>
    %121 = vector.multi_reduction <maximumf>, %120, %cst_47 [1] : vector<8x8xf32> to vector<8xf32>
    %122 = vector.shape_cast %121 : vector<8xf32> to vector<8x1xf32>
    %123 = vector.broadcast %122 : vector<8x1xf32> to vector<8x8xf32>
    %124 = arith.subf %120, %123 : vector<8x8xf32>
    %125 = math.exp %124 : vector<8x8xf32>
    %cst_48 = arith.constant dense<0.000000e+00> : vector<8xf32>
    %126 = vector.multi_reduction <add>, %125, %cst_48 [1] : vector<8x8xf32> to vector<8xf32>
    %127 = vector.shape_cast %126 : vector<8xf32> to vector<8x1xf32>
    %128 = tpu.reciprocal %127 {approx = true} : vector<8x1xf32> -> vector<8x1xf32>
    %129 = vector.broadcast %128 : vector<8x1xf32> to vector<8x8xf32>
    %130 = arith.mulf %125, %129 : vector<8x8xf32>
    %cst_49 = arith.constant dense<0.000000e+00> : vector<8x8xf32>
    %131 = tpu.matmul %130, %115, %cst_49 {dimension_numbers = #tpu.dot_dimension_numbers<[1], [0], [0], [1], [0, 0, 1, 1], [], []>} : vector<8x8xf32>, vector<8x8xf32>, vector<8x8xf32> -> vector<8x8xf32>
    %c8_50 = arith.constant 8 : index
    %c8_51 = arith.constant 8 : index
    %132 = vector.load %arg23[%c8_50, %c8_51] : memref<16x32xf32, #tpu.memory_space<vmem>>, vector<8x8xf32>
    tpu.vector_store %arg23[%c8_50, %c8_51], %131 {strides = array<i32>} : memref<16x32xf32, #tpu.memory_space<vmem>>, vector<8x8xf32>,
    %133 = vector.extract_strided_slice %10 {offsets = [8, 16], sizes = [8, 8], strides = [1, 1]} : vector<16x32xf32> to vector<8x8xf32>
    %134 = vector.extract_strided_slice %11 {offsets = [8, 16], sizes = [8, 8], strides = [1, 1]} : vector<16x32xf32> to vector<8x8xf32>
    %135 = vector.extract_strided_slice %12 {offsets = [8, 16], sizes = [8, 8], strides = [1, 1]} : vector<16x32xf32> to vector<8x8xf32>
    %cst_52 = arith.constant dense<0.000000e+00> : vector<8x8xf32>
    %136 = tpu.matmul %133, %134, %cst_52 {dimension_numbers = #tpu.dot_dimension_numbers<[1], [1], [0], [0], [0, 0, 1, 0], [], []>} : vector<8x8xf32>, vector<8x8xf32>, vector<8x8xf32> -> vector<8x8xf32>
    %cst_53 = arith.constant 0.353553385 : f32
    %137 = vector.broadcast %cst_53 : f32 to vector<8x8xf32>
    %138 = arith.mulf %136, %137 : vector<8x8xf32>
    %cst_54 = arith.constant -1.000000e+09 : f32
    %139 = vector.broadcast %cst_54 : f32 to vector<8x8xf32>
    %140 = arith.select %4, %138, %139 : vector<8x8xi1>, vector<8x8xf32>
    %cst_55 = arith.constant dense<0xFF800000> : vector<8xf32>
    %141 = vector.multi_reduction <maximumf>, %140, %cst_55 [1] : vector<8x8xf32> to vector<8xf32>
    %142 = vector.shape_cast %141 : vector<8xf32> to vector<8x1xf32>
    %143 = vector.broadcast %142 : vector<8x1xf32> to vector<8x8xf32>
    %144 = arith.subf %140, %143 : vector<8x8xf32>
    %145 = math.exp %144 : vector<8x8xf32>
    %cst_56 = arith.constant dense<0.000000e+00> : vector<8xf32>
    %146 = vector.multi_reduction <add>, %145, %cst_56 [1] : vector<8x8xf32> to vector<8xf32>
    %147 = vector.shape_cast %146 : vector<8xf32> to vector<8x1xf32>
    %148 = tpu.reciprocal %147 {approx = true} : vector<8x1xf32> -> vector<8x1xf32>
    %149 = vector.broadcast %148 : vector<8x1xf32> to vector<8x8xf32>
    %150 = arith.mulf %145, %149 : vector<8x8xf32>
    %cst_57 = arith.constant dense<0.000000e+00> : vector<8x8xf32>
    %151 = tpu.matmul %150, %135, %cst_57 {dimension_numbers = #tpu.dot_dimension_numbers<[1], [0], [0], [1], [0, 0, 1, 1], [], []>} : vector<8x8xf32>, vector<8x8xf32>, vector<8x8xf32> -> vector<8x8xf32>
    %c8_58 = arith.constant 8 : index
    %c16_59 = arith.constant 16 : index
    %152 = vector.load %arg23[%c8_58, %c16_59] : memref<16x32xf32, #tpu.memory_space<vmem>>, vector<8x8xf32>
    tpu.vector_store %arg23[%c8_58, %c16_59], %151 {strides = array<i32>} : memref<16x32xf32, #tpu.memory_space<vmem>>, vector<8x8xf32>,
    %153 = vector.extract_strided_slice %10 {offsets = [8, 24], sizes = [8, 8], strides = [1, 1]} : vector<16x32xf32> to vector<8x8xf32>
    %154 = vector.extract_strided_slice %11 {offsets = [8, 24], sizes = [8, 8], strides = [1, 1]} : vector<16x32xf32> to vector<8x8xf32>
    %155 = vector.extract_strided_slice %12 {offsets = [8, 24], sizes = [8, 8], strides = [1, 1]} : vector<16x32xf32> to vector<8x8xf32>
    %cst_60 = arith.constant dense<0.000000e+00> : vector<8x8xf32>
    %156 = tpu.matmul %153, %154, %cst_60 {dimension_numbers = #tpu.dot_dimension_numbers<[1], [1], [0], [0], [0, 0, 1, 0], [], []>} : vector<8x8xf32>, vector<8x8xf32>, vector<8x8xf32> -> vector<8x8xf32>
    %cst_61 = arith.constant 0.353553385 : f32
    %157 = vector.broadcast %cst_61 : f32 to vector<8x8xf32>
    %158 = arith.mulf %156, %157 : vector<8x8xf32>
    %cst_62 = arith.constant -1.000000e+09 : f32
    %159 = vector.broadcast %cst_62 : f32 to vector<8x8xf32>
    %160 = arith.select %4, %158, %159 : vector<8x8xi1>, vector<8x8xf32>
    %cst_63 = arith.constant dense<0xFF800000> : vector<8xf32>
    %161 = vector.multi_reduction <maximumf>, %160, %cst_63 [1] : vector<8x8xf32> to vector<8xf32>
    %162 = vector.shape_cast %161 : vector<8xf32> to vector<8x1xf32>
    %163 = vector.broadcast %162 : vector<8x1xf32> to vector<8x8xf32>
    %164 = arith.subf %160, %163 : vector<8x8xf32>
    %165 = math.exp %164 : vector<8x8xf32>
    %cst_64 = arith.constant dense<0.000000e+00> : vector<8xf32>
    %166 = vector.multi_reduction <add>, %165, %cst_64 [1] : vector<8x8xf32> to vector<8xf32>
    %167 = vector.shape_cast %166 : vector<8xf32> to vector<8x1xf32>
    %168 = tpu.reciprocal %167 {approx = true} : vector<8x1xf32> -> vector<8x1xf32>
    %169 = vector.broadcast %168 : vector<8x1xf32> to vector<8x8xf32>
    %170 = arith.mulf %165, %169 : vector<8x8xf32>
    %cst_65 = arith.constant dense<0.000000e+00> : vector<8x8xf32>
    %171 = tpu.matmul %170, %155, %cst_65 {dimension_numbers = #tpu.dot_dimension_numbers<[1], [0], [0], [1], [0, 0, 1, 1], [], []>} : vector<8x8xf32>, vector<8x8xf32>, vector<8x8xf32> -> vector<8x8xf32>
    %c8_66 = arith.constant 8 : index
    %c24_67 = arith.constant 24 : index
    %172 = vector.load %arg23[%c8_66, %c24_67] : memref<16x32xf32, #tpu.memory_space<vmem>>, vector<8x8xf32>
    tpu.vector_store %arg23[%c8_66, %c24_67], %171 {strides = array<i32>} : memref<16x32xf32, #tpu.memory_space<vmem>>, vector<8x8xf32>,
    %c0_68 = arith.constant 0 : index
    %c0_69 = arith.constant 0 : index
    %173 = vector.load %arg23[%c0_68, %c0_69] : memref<16x32xf32, #tpu.memory_space<vmem>>, vector<16x32xf32>
    %c0_70 = arith.constant 0 : index
    %c0_71 = arith.constant 0 : index
    %174 = vector.load %arg4[%c0_70, %c0_71] : memref<32x32xf32, #tpu.memory_space<vmem>>, vector<32x32xf32>
    %cst_72 = arith.constant dense<0.000000e+00> : vector<16x32xf32>
    %175 = tpu.matmul %173, %174, %cst_72 {dimension_numbers = #tpu.dot_dimension_numbers<[1], [0], [0], [1], [0, 0, 1, 1], [], []>} : vector<16x32xf32>, vector<32x32xf32>, vector<16x32xf32> -> vector<16x32xf32>
    %c0_73 = arith.constant 0 : index
    %c0_74 = arith.constant 0 : index
    %176 = vector.load %arg5[%c0_73, %c0_74] : memref<1x32xf32, #tpu.memory_space<vmem>>, vector<1x32xf32>
    %177 = vector.broadcast %176 : vector<1x32xf32> to vector<16x32xf32>
    %178 = arith.addf %175, %177 : vector<16x32xf32>
    %179 = arith.addf %178, %0 : vector<16x32xf32>
    %cst_75 = arith.constant dense<0.000000e+00> : vector<16xf32>
    %180 = vector.multi_reduction <add>, %179, %cst_75 [1] : vector<16x32xf32> to vector<16xf32>
    %181 = vector.shape_cast %180 : vector<16xf32> to vector<16x1xf32>
    %cst_76 = arith.constant 3.200000e+01 : f32
    %182 = vector.broadcast %cst_76 : f32 to vector<16x1xf32>
    %183 = arith.divf %181, %182 : vector<16x1xf32>
    %184 = vector.broadcast %183 : vector<16x1xf32> to vector<16x32xf32>
    %185 = arith.subf %179, %184 : vector<16x32xf32>
    %186 = vector.broadcast %183 : vector<16x1xf32> to vector<16x32xf32>
    %187 = arith.subf %179, %186 : vector<16x32xf32>
    %188 = arith.mulf %185, %187 : vector<16x32xf32>
    %cst_77 = arith.constant dense<0.000000e+00> : vector<16xf32>
    %189 = vector.multi_reduction <add>, %188, %cst_77 [1] : vector<16x32xf32> to vector<16xf32>
    %190 = vector.shape_cast %189 : vector<16xf32> to vector<16x1xf32>
    %cst_78 = arith.constant 3.200000e+01 : f32
    %191 = vector.broadcast %cst_78 : f32 to vector<16x1xf32>
    %192 = arith.divf %190, %191 : vector<16x1xf32>
    %193 = vector.broadcast %183 : vector<16x1xf32> to vector<16x32xf32>
    %194 = arith.subf %179, %193 : vector<16x32xf32>
    %cst_79 = arith.constant 9.99999997E-7 : f32
    %195 = vector.broadcast %cst_79 : f32 to vector<16x1xf32>
    %196 = arith.addf %192, %195 : vector<16x1xf32>
    %197 = math.rsqrt %196 : vector<16x1xf32>
    %198 = vector.broadcast %197 : vector<16x1xf32> to vector<16x32xf32>
    %199 = arith.mulf %194, %198 : vector<16x32xf32>
    %c0_80 = arith.constant 0 : index
    %c0_81 = arith.constant 0 : index
    %200 = vector.load %arg6[%c0_80, %c0_81] : memref<1x32xf32, #tpu.memory_space<vmem>>, vector<1x32xf32>
    %201 = vector.broadcast %200 : vector<1x32xf32> to vector<16x32xf32>
    %202 = arith.mulf %199, %201 : vector<16x32xf32>
    %c0_82 = arith.constant 0 : index
    %c0_83 = arith.constant 0 : index
    %203 = vector.load %arg7[%c0_82, %c0_83] : memref<1x32xf32, #tpu.memory_space<vmem>>, vector<1x32xf32>
    %204 = vector.broadcast %203 : vector<1x32xf32> to vector<16x32xf32>
    %205 = arith.addf %202, %204 : vector<16x32xf32>
    %c0_84 = arith.constant 0 : index
    %c0_85 = arith.constant 0 : index
    %206 = vector.load %arg8[%c0_84, %c0_85] : memref<32x64xf32, #tpu.memory_space<vmem>>, vector<32x64xf32>
    %cst_86 = arith.constant dense<0.000000e+00> : vector<16x64xf32>
    %207 = tpu.matmul %1, %206, %cst_86 {dimension_numbers = #tpu.dot_dimension_numbers<[1], [0], [0], [1], [0, 0, 1, 1], [], []>} : vector<16x32xf32>, vector<32x64xf32>, vector<16x64xf32> -> vector<16x64xf32>
    %c0_87 = arith.constant 0 : index
    %c0_88 = arith.constant 0 : index
    %208 = vector.load %arg9[%c0_87, %c0_88] : memref<1x64xf32, #tpu.memory_space<vmem>>, vector<1x64xf32>
    %209 = vector.broadcast %208 : vector<1x64xf32> to vector<16x64xf32>
    %210 = arith.addf %207, %209 : vector<16x64xf32>
    %211 = vector.extract_strided_slice %210 {offsets = [0, 0], sizes = [16, 32], strides = [1, 1]} : vector<16x64xf32> to vector<16x32xf32>
    %212 = vector.extract_strided_slice %210 {offsets = [0, 32], sizes = [16, 32], strides = [1, 1]} : vector<16x64xf32> to vector<16x32xf32>
    %c0_89 = arith.constant 0 : index
    %c0_90 = arith.constant 0 : index
    %213 = vector.load %arg10[%c0_89, %c0_90] : memref<32x32xf32, #tpu.memory_space<vmem>>, vector<32x32xf32>
    %cst_91 = arith.constant dense<0.000000e+00> : vector<16x32xf32>
    %214 = tpu.matmul %205, %213, %cst_91 {dimension_numbers = #tpu.dot_dimension_numbers<[1], [0], [0], [1], [0, 0, 1, 1], [], []>} : vector<16x32xf32>, vector<32x32xf32>, vector<16x32xf32> -> vector<16x32xf32>
    %c0_92 = arith.constant 0 : index
    %c0_93 = arith.constant 0 : index
    %215 = vector.load %arg11[%c0_92, %c0_93] : memref<1x32xf32, #tpu.memory_space<vmem>>, vector<1x32xf32>
    %216 = vector.broadcast %215 : vector<1x32xf32> to vector<16x32xf32>
    %217 = arith.addf %214, %216 : vector<16x32xf32>
    %218 = vector.extract_strided_slice %211 {offsets = [0, 0], sizes = [8, 8], strides = [1, 1]} : vector<16x32xf32> to vector<8x8xf32>
    %219 = vector.extract_strided_slice %212 {offsets = [0, 0], sizes = [8, 8], strides = [1, 1]} : vector<16x32xf32> to vector<8x8xf32>
    %220 = vector.extract_strided_slice %217 {offsets = [0, 0], sizes = [8, 8], strides = [1, 1]} : vector<16x32xf32> to vector<8x8xf32>
    %cst_94 = arith.constant dense<0.000000e+00> : vector<8x8xf32>
    %221 = tpu.matmul %218, %219, %cst_94 {dimension_numbers = #tpu.dot_dimension_numbers<[1], [1], [0], [0], [0, 0, 1, 0], [], []>} : vector<8x8xf32>, vector<8x8xf32>, vector<8x8xf32> -> vector<8x8xf32>
    %cst_95 = arith.constant 0.353553385 : f32
    %222 = vector.broadcast %cst_95 : f32 to vector<8x8xf32>
    %223 = arith.mulf %221, %222 : vector<8x8xf32>
    %cst_96 = arith.constant dense<0xFF800000> : vector<8xf32>
    %224 = vector.multi_reduction <maximumf>, %223, %cst_96 [1] : vector<8x8xf32> to vector<8xf32>
    %225 = vector.shape_cast %224 : vector<8xf32> to vector<8x1xf32>
    %226 = vector.broadcast %225 : vector<8x1xf32> to vector<8x8xf32>
    %227 = arith.subf %223, %226 : vector<8x8xf32>
    %228 = math.exp %227 : vector<8x8xf32>
    %cst_97 = arith.constant dense<0.000000e+00> : vector<8xf32>
    %229 = vector.multi_reduction <add>, %228, %cst_97 [1] : vector<8x8xf32> to vector<8xf32>
    %230 = vector.shape_cast %229 : vector<8xf32> to vector<8x1xf32>
    %231 = tpu.reciprocal %230 {approx = true} : vector<8x1xf32> -> vector<8x1xf32>
    %232 = vector.broadcast %231 : vector<8x1xf32> to vector<8x8xf32>
    %233 = arith.mulf %228, %232 : vector<8x8xf32>
    %cst_98 = arith.constant dense<0.000000e+00> : vector<8x8xf32>
    %234 = tpu.matmul %233, %220, %cst_98 {dimension_numbers = #tpu.dot_dimension_numbers<[1], [0], [0], [1], [0, 0, 1, 1], [], []>} : vector<8x8xf32>, vector<8x8xf32>, vector<8x8xf32> -> vector<8x8xf32>
    %c0_99 = arith.constant 0 : index
    %c0_100 = arith.constant 0 : index
    %235 = vector.load %arg23[%c0_99, %c0_100] : memref<16x32xf32, #tpu.memory_space<vmem>>, vector<8x8xf32>
    tpu.vector_store %arg23[%c0_99, %c0_100], %234 {strides = array<i32>} : memref<16x32xf32, #tpu.memory_space<vmem>>, vector<8x8xf32>,
    %236 = vector.extract_strided_slice %211 {offsets = [0, 8], sizes = [8, 8], strides = [1, 1]} : vector<16x32xf32> to vector<8x8xf32>
    %237 = vector.extract_strided_slice %212 {offsets = [0, 8], sizes = [8, 8], strides = [1, 1]} : vector<16x32xf32> to vector<8x8xf32>
    %238 = vector.extract_strided_slice %217 {offsets = [0, 8], sizes = [8, 8], strides = [1, 1]} : vector<16x32xf32> to vector<8x8xf32>
    %cst_101 = arith.constant dense<0.000000e+00> : vector<8x8xf32>
    %239 = tpu.matmul %236, %237, %cst_101 {dimension_numbers = #tpu.dot_dimension_numbers<[1], [1], [0], [0], [0, 0, 1, 0], [], []>} : vector<8x8xf32>, vector<8x8xf32>, vector<8x8xf32> -> vector<8x8xf32>
    %cst_102 = arith.constant 0.353553385 : f32
    %240 = vector.broadcast %cst_102 : f32 to vector<8x8xf32>
    %241 = arith.mulf %239, %240 : vector<8x8xf32>
    %cst_103 = arith.constant dense<0xFF800000> : vector<8xf32>
    %242 = vector.multi_reduction <maximumf>, %241, %cst_103 [1] : vector<8x8xf32> to vector<8xf32>
    %243 = vector.shape_cast %242 : vector<8xf32> to vector<8x1xf32>
    %244 = vector.broadcast %243 : vector<8x1xf32> to vector<8x8xf32>
    %245 = arith.subf %241, %244 : vector<8x8xf32>
    %246 = math.exp %245 : vector<8x8xf32>
    %cst_104 = arith.constant dense<0.000000e+00> : vector<8xf32>
    %247 = vector.multi_reduction <add>, %246, %cst_104 [1] : vector<8x8xf32> to vector<8xf32>
    %248 = vector.shape_cast %247 : vector<8xf32> to vector<8x1xf32>
    %249 = tpu.reciprocal %248 {approx = true} : vector<8x1xf32> -> vector<8x1xf32>
    %250 = vector.broadcast %249 : vector<8x1xf32> to vector<8x8xf32>
    %251 = arith.mulf %246, %250 : vector<8x8xf32>
    %cst_105 = arith.constant dense<0.000000e+00> : vector<8x8xf32>
    %252 = tpu.matmul %251, %238, %cst_105 {dimension_numbers = #tpu.dot_dimension_numbers<[1], [0], [0], [1], [0, 0, 1, 1], [], []>} : vector<8x8xf32>, vector<8x8xf32>, vector<8x8xf32> -> vector<8x8xf32>
    %c0_106 = arith.constant 0 : index
    %c8_107 = arith.constant 8 : index
    %253 = vector.load %arg23[%c0_106, %c8_107] : memref<16x32xf32, #tpu.memory_space<vmem>>, vector<8x8xf32>
    tpu.vector_store %arg23[%c0_106, %c8_107], %252 {strides = array<i32>} : memref<16x32xf32, #tpu.memory_space<vmem>>, vector<8x8xf32>,
    %254 = vector.extract_strided_slice %211 {offsets = [0, 16], sizes = [8, 8], strides = [1, 1]} : vector<16x32xf32> to vector<8x8xf32>
    %255 = vector.extract_strided_slice %212 {offsets = [0, 16], sizes = [8, 8], strides = [1, 1]} : vector<16x32xf32> to vector<8x8xf32>
    %256 = vector.extract_strided_slice %217 {offsets = [0, 16], sizes = [8, 8], strides = [1, 1]} : vector<16x32xf32> to vector<8x8xf32>
    %cst_108 = arith.constant dense<0.000000e+00> : vector<8x8xf32>
    %257 = tpu.matmul %254, %255, %cst_108 {dimension_numbers = #tpu.dot_dimension_numbers<[1], [1], [0], [0], [0, 0, 1, 0], [], []>} : vector<8x8xf32>, vector<8x8xf32>, vector<8x8xf32> -> vector<8x8xf32>
    %cst_109 = arith.constant 0.353553385 : f32
    %258 = vector.broadcast %cst_109 : f32 to vector<8x8xf32>
    %259 = arith.mulf %257, %258 : vector<8x8xf32>
    %cst_110 = arith.constant dense<0xFF800000> : vector<8xf32>
    %260 = vector.multi_reduction <maximumf>, %259, %cst_110 [1] : vector<8x8xf32> to vector<8xf32>
    %261 = vector.shape_cast %260 : vector<8xf32> to vector<8x1xf32>
    %262 = vector.broadcast %261 : vector<8x1xf32> to vector<8x8xf32>
    %263 = arith.subf %259, %262 : vector<8x8xf32>
    %264 = math.exp %263 : vector<8x8xf32>
    %cst_111 = arith.constant dense<0.000000e+00> : vector<8xf32>
    %265 = vector.multi_reduction <add>, %264, %cst_111 [1] : vector<8x8xf32> to vector<8xf32>
    %266 = vector.shape_cast %265 : vector<8xf32> to vector<8x1xf32>
    %267 = tpu.reciprocal %266 {approx = true} : vector<8x1xf32> -> vector<8x1xf32>
    %268 = vector.broadcast %267 : vector<8x1xf32> to vector<8x8xf32>
    %269 = arith.mulf %264, %268 : vector<8x8xf32>
    %cst_112 = arith.constant dense<0.000000e+00> : vector<8x8xf32>
    %270 = tpu.matmul %269, %256, %cst_112 {dimension_numbers = #tpu.dot_dimension_numbers<[1], [0], [0], [1], [0, 0, 1, 1], [], []>} : vector<8x8xf32>, vector<8x8xf32>, vector<8x8xf32> -> vector<8x8xf32>
    %c0_113 = arith.constant 0 : index
    %c16_114 = arith.constant 16 : index
    %271 = vector.load %arg23[%c0_113, %c16_114] : memref<16x32xf32, #tpu.memory_space<vmem>>, vector<8x8xf32>
    tpu.vector_store %arg23[%c0_113, %c16_114], %270 {strides = array<i32>} : memref<16x32xf32, #tpu.memory_space<vmem>>, vector<8x8xf32>,
    %272 = vector.extract_strided_slice %211 {offsets = [0, 24], sizes = [8, 8], strides = [1, 1]} : vector<16x32xf32> to vector<8x8xf32>
    %273 = vector.extract_strided_slice %212 {offsets = [0, 24], sizes = [8, 8], strides = [1, 1]} : vector<16x32xf32> to vector<8x8xf32>
    %274 = vector.extract_strided_slice %217 {offsets = [0, 24], sizes = [8, 8], strides = [1, 1]} : vector<16x32xf32> to vector<8x8xf32>
    %cst_115 = arith.constant dense<0.000000e+00> : vector<8x8xf32>
    %275 = tpu.matmul %272, %273, %cst_115 {dimension_numbers = #tpu.dot_dimension_numbers<[1], [1], [0], [0], [0, 0, 1, 0], [], []>} : vector<8x8xf32>, vector<8x8xf32>, vector<8x8xf32> -> vector<8x8xf32>
    %cst_116 = arith.constant 0.353553385 : f32
    %276 = vector.broadcast %cst_116 : f32 to vector<8x8xf32>
    %277 = arith.mulf %275, %276 : vector<8x8xf32>
    %cst_117 = arith.constant dense<0xFF800000> : vector<8xf32>
    %278 = vector.multi_reduction <maximumf>, %277, %cst_117 [1] : vector<8x8xf32> to vector<8xf32>
    %279 = vector.shape_cast %278 : vector<8xf32> to vector<8x1xf32>
    %280 = vector.broadcast %279 : vector<8x1xf32> to vector<8x8xf32>
    %281 = arith.subf %277, %280 : vector<8x8xf32>
    %282 = math.exp %281 : vector<8x8xf32>
    %cst_118 = arith.constant dense<0.000000e+00> : vector<8xf32>
    %283 = vector.multi_reduction <add>, %282, %cst_118 [1] : vector<8x8xf32> to vector<8xf32>
    %284 = vector.shape_cast %283 : vector<8xf32> to vector<8x1xf32>
    %285 = tpu.reciprocal %284 {approx = true} : vector<8x1xf32> -> vector<8x1xf32>
    %286 = vector.broadcast %285 : vector<8x1xf32> to vector<8x8xf32>
    %287 = arith.mulf %282, %286 : vector<8x8xf32>
    %cst_119 = arith.constant dense<0.000000e+00> : vector<8x8xf32>
    %288 = tpu.matmul %287, %274, %cst_119 {dimension_numbers = #tpu.dot_dimension_numbers<[1], [0], [0], [1], [0, 0, 1, 1], [], []>} : vector<8x8xf32>, vector<8x8xf32>, vector<8x8xf32> -> vector<8x8xf32>
    %c0_120 = arith.constant 0 : index
    %c24_121 = arith.constant 24 : index
    %289 = vector.load %arg23[%c0_120, %c24_121] : memref<16x32xf32, #tpu.memory_space<vmem>>, vector<8x8xf32>
    tpu.vector_store %arg23[%c0_120, %c24_121], %288 {strides = array<i32>} : memref<16x32xf32, #tpu.memory_space<vmem>>, vector<8x8xf32>,
    %290 = vector.extract_strided_slice %211 {offsets = [8, 0], sizes = [8, 8], strides = [1, 1]} : vector<16x32xf32> to vector<8x8xf32>
    %291 = vector.extract_strided_slice %212 {offsets = [8, 0], sizes = [8, 8], strides = [1, 1]} : vector<16x32xf32> to vector<8x8xf32>
    %292 = vector.extract_strided_slice %217 {offsets = [8, 0], sizes = [8, 8], strides = [1, 1]} : vector<16x32xf32> to vector<8x8xf32>
    %cst_122 = arith.constant dense<0.000000e+00> : vector<8x8xf32>
    %293 = tpu.matmul %290, %291, %cst_122 {dimension_numbers = #tpu.dot_dimension_numbers<[1], [1], [0], [0], [0, 0, 1, 0], [], []>} : vector<8x8xf32>, vector<8x8xf32>, vector<8x8xf32> -> vector<8x8xf32>
    %cst_123 = arith.constant 0.353553385 : f32
    %294 = vector.broadcast %cst_123 : f32 to vector<8x8xf32>
    %295 = arith.mulf %293, %294 : vector<8x8xf32>
    %cst_124 = arith.constant dense<0xFF800000> : vector<8xf32>
    %296 = vector.multi_reduction <maximumf>, %295, %cst_124 [1] : vector<8x8xf32> to vector<8xf32>
    %297 = vector.shape_cast %296 : vector<8xf32> to vector<8x1xf32>
    %298 = vector.broadcast %297 : vector<8x1xf32> to vector<8x8xf32>
    %299 = arith.subf %295, %298 : vector<8x8xf32>
    %300 = math.exp %299 : vector<8x8xf32>
    %cst_125 = arith.constant dense<0.000000e+00> : vector<8xf32>
    %301 = vector.multi_reduction <add>, %300, %cst_125 [1] : vector<8x8xf32> to vector<8xf32>
    %302 = vector.shape_cast %301 : vector<8xf32> to vector<8x1xf32>
    %303 = tpu.reciprocal %302 {approx = true} : vector<8x1xf32> -> vector<8x1xf32>
    %304 = vector.broadcast %303 : vector<8x1xf32> to vector<8x8xf32>
    %305 = arith.mulf %300, %304 : vector<8x8xf32>
    %cst_126 = arith.constant dense<0.000000e+00> : vector<8x8xf32>
    %306 = tpu.matmul %305, %292, %cst_126 {dimension_numbers = #tpu.dot_dimension_numbers<[1], [0], [0], [1], [0, 0, 1, 1], [], []>} : vector<8x8xf32>, vector<8x8xf32>, vector<8x8xf32> -> vector<8x8xf32>
    %c8_127 = arith.constant 8 : index
    %c0_128 = arith.constant 0 : index
    %307 = vector.load %arg23[%c8_127, %c0_128] : memref<16x32xf32, #tpu.memory_space<vmem>>, vector<8x8xf32>
    tpu.vector_store %arg23[%c8_127, %c0_128], %306 {strides = array<i32>} : memref<16x32xf32, #tpu.memory_space<vmem>>, vector<8x8xf32>,
    %308 = vector.extract_strided_slice %211 {offsets = [8, 8], sizes = [8, 8], strides = [1, 1]} : vector<16x32xf32> to vector<8x8xf32>
    %309 = vector.extract_strided_slice %212 {offsets = [8, 8], sizes = [8, 8], strides = [1, 1]} : vector<16x32xf32> to vector<8x8xf32>
    %310 = vector.extract_strided_slice %217 {offsets = [8, 8], sizes = [8, 8], strides = [1, 1]} : vector<16x32xf32> to vector<8x8xf32>
    %cst_129 = arith.constant dense<0.000000e+00> : vector<8x8xf32>
    %311 = tpu.matmul %308, %309, %cst_129 {dimension_numbers = #tpu.dot_dimension_numbers<[1], [1], [0], [0], [0, 0, 1, 0], [], []>} : vector<8x8xf32>, vector<8x8xf32>, vector<8x8xf32> -> vector<8x8xf32>
    %cst_130 = arith.constant 0.353553385 : f32
    %312 = vector.broadcast %cst_130 : f32 to vector<8x8xf32>
    %313 = arith.mulf %311, %312 : vector<8x8xf32>
    %cst_131 = arith.constant dense<0xFF800000> : vector<8xf32>
    %314 = vector.multi_reduction <maximumf>, %313, %cst_131 [1] : vector<8x8xf32> to vector<8xf32>
    %315 = vector.shape_cast %314 : vector<8xf32> to vector<8x1xf32>
    %316 = vector.broadcast %315 : vector<8x1xf32> to vector<8x8xf32>
    %317 = arith.subf %313, %316 : vector<8x8xf32>
    %318 = math.exp %317 : vector<8x8xf32>
    %cst_132 = arith.constant dense<0.000000e+00> : vector<8xf32>
    %319 = vector.multi_reduction <add>, %318, %cst_132 [1] : vector<8x8xf32> to vector<8xf32>
    %320 = vector.shape_cast %319 : vector<8xf32> to vector<8x1xf32>
    %321 = tpu.reciprocal %320 {approx = true} : vector<8x1xf32> -> vector<8x1xf32>
    %322 = vector.broadcast %321 : vector<8x1xf32> to vector<8x8xf32>
    %323 = arith.mulf %318, %322 : vector<8x8xf32>
    %cst_133 = arith.constant dense<0.000000e+00> : vector<8x8xf32>
    %324 = tpu.matmul %323, %310, %cst_133 {dimension_numbers = #tpu.dot_dimension_numbers<[1], [0], [0], [1], [0, 0, 1, 1], [], []>} : vector<8x8xf32>, vector<8x8xf32>, vector<8x8xf32> -> vector<8x8xf32>
    %c8_134 = arith.constant 8 : index
    %c8_135 = arith.constant 8 : index
    %325 = vector.load %arg23[%c8_134, %c8_135] : memref<16x32xf32, #tpu.memory_space<vmem>>, vector<8x8xf32>
    tpu.vector_store %arg23[%c8_134, %c8_135], %324 {strides = array<i32>} : memref<16x32xf32, #tpu.memory_space<vmem>>, vector<8x8xf32>,
    %326 = vector.extract_strided_slice %211 {offsets = [8, 16], sizes = [8, 8], strides = [1, 1]} : vector<16x32xf32> to vector<8x8xf32>
    %327 = vector.extract_strided_slice %212 {offsets = [8, 16], sizes = [8, 8], strides = [1, 1]} : vector<16x32xf32> to vector<8x8xf32>
    %328 = vector.extract_strided_slice %217 {offsets = [8, 16], sizes = [8, 8], strides = [1, 1]} : vector<16x32xf32> to vector<8x8xf32>
    %cst_136 = arith.constant dense<0.000000e+00> : vector<8x8xf32>
    %329 = tpu.matmul %326, %327, %cst_136 {dimension_numbers = #tpu.dot_dimension_numbers<[1], [1], [0], [0], [0, 0, 1, 0], [], []>} : vector<8x8xf32>, vector<8x8xf32>, vector<8x8xf32> -> vector<8x8xf32>
    %cst_137 = arith.constant 0.353553385 : f32
    %330 = vector.broadcast %cst_137 : f32 to vector<8x8xf32>
    %331 = arith.mulf %329, %330 : vector<8x8xf32>
    %cst_138 = arith.constant dense<0xFF800000> : vector<8xf32>
    %332 = vector.multi_reduction <maximumf>, %331, %cst_138 [1] : vector<8x8xf32> to vector<8xf32>
    %333 = vector.shape_cast %332 : vector<8xf32> to vector<8x1xf32>
    %334 = vector.broadcast %333 : vector<8x1xf32> to vector<8x8xf32>
    %335 = arith.subf %331, %334 : vector<8x8xf32>
    %336 = math.exp %335 : vector<8x8xf32>
    %cst_139 = arith.constant dense<0.000000e+00> : vector<8xf32>
    %337 = vector.multi_reduction <add>, %336, %cst_139 [1] : vector<8x8xf32> to vector<8xf32>
    %338 = vector.shape_cast %337 : vector<8xf32> to vector<8x1xf32>
    %339 = tpu.reciprocal %338 {approx = true} : vector<8x1xf32> -> vector<8x1xf32>
    %340 = vector.broadcast %339 : vector<8x1xf32> to vector<8x8xf32>
    %341 = arith.mulf %336, %340 : vector<8x8xf32>
    %cst_140 = arith.constant dense<0.000000e+00> : vector<8x8xf32>
    %342 = tpu.matmul %341, %328, %cst_140 {dimension_numbers = #tpu.dot_dimension_numbers<[1], [0], [0], [1], [0, 0, 1, 1], [], []>} : vector<8x8xf32>, vector<8x8xf32>, vector<8x8xf32> -> vector<8x8xf32>
    %c8_141 = arith.constant 8 : index
    %c16_142 = arith.constant 16 : index
    %343 = vector.load %arg23[%c8_141, %c16_142] : memref<16x32xf32, #tpu.memory_space<vmem>>, vector<8x8xf32>
    tpu.vector_store %arg23[%c8_141, %c16_142], %342 {strides = array<i32>} : memref<16x32xf32, #tpu.memory_space<vmem>>, vector<8x8xf32>,
    %344 = vector.extract_strided_slice %211 {offsets = [8, 24], sizes = [8, 8], strides = [1, 1]} : vector<16x32xf32> to vector<8x8xf32>
    %345 = vector.extract_strided_slice %212 {offsets = [8, 24], sizes = [8, 8], strides = [1, 1]} : vector<16x32xf32> to vector<8x8xf32>
    %346 = vector.extract_strided_slice %217 {offsets = [8, 24], sizes = [8, 8], strides = [1, 1]} : vector<16x32xf32> to vector<8x8xf32>
    %cst_143 = arith.constant dense<0.000000e+00> : vector<8x8xf32>
    %347 = tpu.matmul %344, %345, %cst_143 {dimension_numbers = #tpu.dot_dimension_numbers<[1], [1], [0], [0], [0, 0, 1, 0], [], []>} : vector<8x8xf32>, vector<8x8xf32>, vector<8x8xf32> -> vector<8x8xf32>
    %cst_144 = arith.constant 0.353553385 : f32
    %348 = vector.broadcast %cst_144 : f32 to vector<8x8xf32>
    %349 = arith.mulf %347, %348 : vector<8x8xf32>
    %cst_145 = arith.constant dense<0xFF800000> : vector<8xf32>
    %350 = vector.multi_reduction <maximumf>, %349, %cst_145 [1] : vector<8x8xf32> to vector<8xf32>
    %351 = vector.shape_cast %350 : vector<8xf32> to vector<8x1xf32>
    %352 = vector.broadcast %351 : vector<8x1xf32> to vector<8x8xf32>
    %353 = arith.subf %349, %352 : vector<8x8xf32>
    %354 = math.exp %353 : vector<8x8xf32>
    %cst_146 = arith.constant dense<0.000000e+00> : vector<8xf32>
    %355 = vector.multi_reduction <add>, %354, %cst_146 [1] : vector<8x8xf32> to vector<8xf32>
    %356 = vector.shape_cast %355 : vector<8xf32> to vector<8x1xf32>
    %357 = tpu.reciprocal %356 {approx = true} : vector<8x1xf32> -> vector<8x1xf32>
    %358 = vector.broadcast %357 : vector<8x1xf32> to vector<8x8xf32>
    %359 = arith.mulf %354, %358 : vector<8x8xf32>
    %cst_147 = arith.constant dense<0.000000e+00> : vector<8x8xf32>
    %360 = tpu.matmul %359, %346, %cst_147 {dimension_numbers = #tpu.dot_dimension_numbers<[1], [0], [0], [1], [0, 0, 1, 1], [], []>} : vector<8x8xf32>, vector<8x8xf32>, vector<8x8xf32> -> vector<8x8xf32>
    %c8_148 = arith.constant 8 : index
    %c24_149 = arith.constant 24 : index
    %361 = vector.load %arg23[%c8_148, %c24_149] : memref<16x32xf32, #tpu.memory_space<vmem>>, vector<8x8xf32>
    tpu.vector_store %arg23[%c8_148, %c24_149], %360 {strides = array<i32>} : memref<16x32xf32, #tpu.memory_space<vmem>>, vector<8x8xf32>,
    %c0_150 = arith.constant 0 : index
    %c0_151 = arith.constant 0 : index
    %362 = vector.load %arg23[%c0_150, %c0_151] : memref<16x32xf32, #tpu.memory_space<vmem>>, vector<16x32xf32>
    %c0_152 = arith.constant 0 : index
    %c0_153 = arith.constant 0 : index
    %363 = vector.load %arg12[%c0_152, %c0_153] : memref<32x32xf32, #tpu.memory_space<vmem>>, vector<32x32xf32>
    %cst_154 = arith.constant dense<0.000000e+00> : vector<16x32xf32>
    %364 = tpu.matmul %362, %363, %cst_154 {dimension_numbers = #tpu.dot_dimension_numbers<[1], [0], [0], [1], [0, 0, 1, 1], [], []>} : vector<16x32xf32>, vector<32x32xf32>, vector<16x32xf32> -> vector<16x32xf32>
    %c0_155 = arith.constant 0 : index
    %c0_156 = arith.constant 0 : index
    %365 = vector.load %arg13[%c0_155, %c0_156] : memref<1x32xf32, #tpu.memory_space<vmem>>, vector<1x32xf32>
    %366 = vector.broadcast %365 : vector<1x32xf32> to vector<16x32xf32>
    %367 = arith.addf %364, %366 : vector<16x32xf32>
    %368 = arith.addf %367, %205 : vector<16x32xf32>
    %cst_157 = arith.constant dense<0.000000e+00> : vector<16xf32>
    %369 = vector.multi_reduction <add>, %368, %cst_157 [1] : vector<16x32xf32> to vector<16xf32>
    %370 = vector.shape_cast %369 : vector<16xf32> to vector<16x1xf32>
    %cst_158 = arith.constant 3.200000e+01 : f32
    %371 = vector.broadcast %cst_158 : f32 to vector<16x1xf32>
    %372 = arith.divf %370, %371 : vector<16x1xf32>
    %373 = vector.broadcast %372 : vector<16x1xf32> to vector<16x32xf32>
    %374 = arith.subf %368, %373 : vector<16x32xf32>
    %375 = vector.broadcast %372 : vector<16x1xf32> to vector<16x32xf32>
    %376 = arith.subf %368, %375 : vector<16x32xf32>
    %377 = arith.mulf %374, %376 : vector<16x32xf32>
    %cst_159 = arith.constant dense<0.000000e+00> : vector<16xf32>
    %378 = vector.multi_reduction <add>, %377, %cst_159 [1] : vector<16x32xf32> to vector<16xf32>
    %379 = vector.shape_cast %378 : vector<16xf32> to vector<16x1xf32>
    %cst_160 = arith.constant 3.200000e+01 : f32
    %380 = vector.broadcast %cst_160 : f32 to vector<16x1xf32>
    %381 = arith.divf %379, %380 : vector<16x1xf32>
    %382 = vector.broadcast %372 : vector<16x1xf32> to vector<16x32xf32>
    %383 = arith.subf %368, %382 : vector<16x32xf32>
    %cst_161 = arith.constant 9.99999997E-7 : f32
    %384 = vector.broadcast %cst_161 : f32 to vector<16x1xf32>
    %385 = arith.addf %381, %384 : vector<16x1xf32>
    %386 = math.rsqrt %385 : vector<16x1xf32>
    %387 = vector.broadcast %386 : vector<16x1xf32> to vector<16x32xf32>
    %388 = arith.mulf %383, %387 : vector<16x32xf32>
    %c0_162 = arith.constant 0 : index
    %c0_163 = arith.constant 0 : index
    %389 = vector.load %arg14[%c0_162, %c0_163] : memref<1x32xf32, #tpu.memory_space<vmem>>, vector<1x32xf32>
    %390 = vector.broadcast %389 : vector<1x32xf32> to vector<16x32xf32>
    %391 = arith.mulf %388, %390 : vector<16x32xf32>
    %c0_164 = arith.constant 0 : index
    %c0_165 = arith.constant 0 : index
    %392 = vector.load %arg15[%c0_164, %c0_165] : memref<1x32xf32, #tpu.memory_space<vmem>>, vector<1x32xf32>
    %393 = vector.broadcast %392 : vector<1x32xf32> to vector<16x32xf32>
    %394 = arith.addf %391, %393 : vector<16x32xf32>
    %c0_166 = arith.constant 0 : index
    %c0_167 = arith.constant 0 : index
    %395 = vector.load %arg16[%c0_166, %c0_167] : memref<32x64xf32, #tpu.memory_space<vmem>>, vector<32x64xf32>
    %cst_168 = arith.constant dense<0.000000e+00> : vector<16x64xf32>
    %396 = tpu.matmul %394, %395, %cst_168 {dimension_numbers = #tpu.dot_dimension_numbers<[1], [0], [0], [1], [0, 0, 1, 1], [], []>} : vector<16x32xf32>, vector<32x64xf32>, vector<16x64xf32> -> vector<16x64xf32>
    %c0_169 = arith.constant 0 : index
    %c0_170 = arith.constant 0 : index
    %397 = vector.load %arg17[%c0_169, %c0_170] : memref<1x64xf32, #tpu.memory_space<vmem>>, vector<1x64xf32>
    %398 = vector.broadcast %397 : vector<1x64xf32> to vector<16x64xf32>
    %399 = arith.addf %396, %398 : vector<16x64xf32>
    %cst_171 = arith.constant 0.000000e+00 : f32
    %400 = vector.broadcast %cst_171 : f32 to vector<16x64xf32>
    %401 = arith.maximumf %399, %400 : vector<16x64xf32>
    %c0_172 = arith.constant 0 : index
    %c0_173 = arith.constant 0 : index
    %402 = vector.load %arg18[%c0_172, %c0_173] : memref<64x32xf32, #tpu.memory_space<vmem>>, vector<64x32xf32>
    %cst_174 = arith.constant dense<0.000000e+00> : vector<16x32xf32>
    %403 = tpu.matmul %401, %402, %cst_174 {dimension_numbers = #tpu.dot_dimension_numbers<[1], [0], [0], [1], [0, 0, 1, 1], [], []>} : vector<16x64xf32>, vector<64x32xf32>, vector<16x32xf32> -> vector<16x32xf32>
    %c0_175 = arith.constant 0 : index
    %c0_176 = arith.constant 0 : index
    %404 = vector.load %arg19[%c0_175, %c0_176] : memref<1x32xf32, #tpu.memory_space<vmem>>, vector<1x32xf32>
    %405 = vector.broadcast %404 : vector<1x32xf32> to vector<16x32xf32>
    %406 = arith.addf %403, %405 : vector<16x32xf32>
    %407 = arith.addf %406, %394 : vector<16x32xf32>
    %cst_177 = arith.constant dense<0.000000e+00> : vector<16xf32>
    %408 = vector.multi_reduction <add>, %407, %cst_177 [1] : vector<16x32xf32> to vector<16xf32>
    %409 = vector.shape_cast %408 : vector<16xf32> to vector<16x1xf32>
    %cst_178 = arith.constant 3.200000e+01 : f32
    %410 = vector.broadcast %cst_178 : f32 to vector<16x1xf32>
    %411 = arith.divf %409, %410 : vector<16x1xf32>
    %412 = vector.broadcast %411 : vector<16x1xf32> to vector<16x32xf32>
    %413 = arith.subf %407, %412 : vector<16x32xf32>
    %414 = vector.broadcast %411 : vector<16x1xf32> to vector<16x32xf32>
    %415 = arith.subf %407, %414 : vector<16x32xf32>
    %416 = arith.mulf %413, %415 : vector<16x32xf32>
    %cst_179 = arith.constant dense<0.000000e+00> : vector<16xf32>
    %417 = vector.multi_reduction <add>, %416, %cst_179 [1] : vector<16x32xf32> to vector<16xf32>
    %418 = vector.shape_cast %417 : vector<16xf32> to vector<16x1xf32>
    %cst_180 = arith.constant 3.200000e+01 : f32
    %419 = vector.broadcast %cst_180 : f32 to vector<16x1xf32>
    %420 = arith.divf %418, %419 : vector<16x1xf32>
    %421 = vector.broadcast %411 : vector<16x1xf32> to vector<16x32xf32>
    %422 = arith.subf %407, %421 : vector<16x32xf32>
    %cst_181 = arith.constant 9.99999997E-7 : f32
    %423 = vector.broadcast %cst_181 : f32 to vector<16x1xf32>
    %424 = arith.addf %420, %423 : vector<16x1xf32>
    %425 = math.rsqrt %424 : vector<16x1xf32>
    %426 = vector.broadcast %425 : vector<16x1xf32> to vector<16x32xf32>
    %427 = arith.mulf %422, %426 : vector<16x32xf32>
    %c0_182 = arith.constant 0 : index
    %c0_183 = arith.constant 0 : index
    %428 = vector.load %arg20[%c0_182, %c0_183] : memref<1x32xf32, #tpu.memory_space<vmem>>, vector<1x32xf32>
    %429 = vector.broadcast %428 : vector<1x32xf32> to vector<16x32xf32>
    %430 = arith.mulf %427, %429 : vector<16x32xf32>
    %c0_184 = arith.constant 0 : index
    %c0_185 = arith.constant 0 : index
    %431 = vector.load %arg21[%c0_184, %c0_185] : memref<1x32xf32, #tpu.memory_space<vmem>>, vector<1x32xf32>
    %432 = vector.broadcast %431 : vector<1x32xf32> to vector<16x32xf32>
    %433 = arith.addf %430, %432 : vector<16x32xf32>
    %c0_186 = arith.constant 0 : index
    %c0_187 = arith.constant 0 : index
    %434 = vector.load %arg22[%c0_186, %c0_187] : memref<16x32xf32, #tpu.memory_space<vmem>>, vector<16x32xf32>
    tpu.vector_store %arg22[%c0_186, %c0_187], %433 {strides = array<i32>} : memref<16x32xf32, #tpu.memory_space<vmem>>, vector<16x32xf32>,
    return
  }
}

</mosaic_0001>

<bundles_post_ra>
// kernel: decoder_layer.1
= control target key start
LH: loop header
LB: loop body
LE: loop exit
PB: predicated region body
PF: predicated region fallthrough
CT: control target
= control target key end

     0   :  { %s5144_s0 = inlined_call_operand.hbm [shape: f32[16,32], index: 0, kind: input, shape index: {}]   ;;  %s5145_s1 = inlined_call_operand.hbm [shape: f32[16,32], index: 1, kind: input, shape index: {}]   ;;  %s5146_s2 = inlined_call_operand.vmem [shape: f32[32,96], index: 2, kind: input, shape index: {}]   ;;  %s5147_s3 = inlined_call_operand.vmem [shape: f32[1,96], index: 3, kind: input, shape index: {}]   ;;  %s5148_s4 = inlined_call_operand.vmem [shape: f32[32,32], index: 4, kind: input, shape index: {}]   ;;  %s5149_s5 = inlined_call_operand.vmem [shape: f32[1,32], index: 5, kind: input, shape index: {}]   ;;  %s5150_s6 = inlined_call_operand.vmem [shape: f32[1,32], index: 6, kind: input, shape index: {}]   ;;  %s5151_s7 = inlined_call_operand.vmem [shape: f32[1,32], index: 7, kind: input, shape index: {}]   ;;  %s5152_s8 = inlined_call_operand.vmem [shape: f32[32,64], index: 8, kind: input, shape index: {}]   ;;  %s5153_s9 = inlined_call_operand.vmem [shape: f32[1,64], index: 9, kind: input, shape index: {}]   ;;  %s5154_s10 = inlined_call_operand.hbm [shape: f32[32,32], index: 10, kind: input, shape index: {}]   ;;  %s5155_s11 = inlined_call_operand.vmem [shape: f32[1,32], index: 11, kind: input, shape index: {}]   ;;  %s5156_s12 = inlined_call_operand.hbm [shape: f32[32,32], index: 12, kind: input, shape index: {}]   ;;  %s5157_s13 = inlined_call_operand.vmem [shape: f32[1,32], index: 13, kind: input, shape index: {}]   ;;  %s5158_s14 = inlined_call_operand.vmem [shape: f32[1,32], index: 14, kind: input, shape index: {}]   ;;  %s5159_s15 = inlined_call_operand.vmem [shape: f32[1,32], index: 15, kind: input, shape index: {}]   ;;  %s5160_s16 = inlined_call_operand.hbm [shape: f32[32,64], index: 16, kind: input, shape index: {}]   ;;  %s5161_s17 = inlined_call_operand.vmem [shape: f32[1,64], index: 17, kind: input, shape index: {}]   ;;  %s5162_s18 = inlined_call_operand.vmem [shape: f32[64,32], index: 18, kind: input, shape index: {}]   ;;  %s5163_s19 = inlined_call_operand.vmem [shape: f32[1,32], index: 19, kind: input, shape index: {}]   ;;  %s5164_s20 = inlined_call_operand.vmem [shape: f32[1,32], index: 20, kind: input, shape index: {}]   ;;  %s5165_s21 = inlined_call_operand.vmem [shape: f32[1,32], index: 21, kind: input, shape index: {}]   ;;  %s5166_s22 = inlined_call_operand.hbm [shape: f32[16,32], index: 22, kind: output, shape index: {}]  }
   0x1   :  { %5172 = sst [smem:[#allocation17_spill]] %s5144_s0 }
   0x2   :  { %5173 = sst [smem:[#allocation18_spill]] %s5145_s1 }
   0x3   :  { %5174 = sst [smem:[#allocation19_spill]] %s5146_s2 }
   0x4   :  { %5175 = sst [smem:[#allocation20_spill]] %s5147_s3 }
   0x5   :  { %5176 = sst [smem:[#allocation21_spill]] %s5148_s4 }
   0x6   :  { %5177 = sst [smem:[#allocation22_spill]] %s5149_s5 }
   0x7   :  { %5178 = sst [smem:[#allocation23_spill]] %s5150_s6 }
   0x8   :  { %5179 = sst [smem:[#allocation24_spill]] %s5165_s21 }
   0x9   :  { %5180 = sst [smem:[#allocation25_spill]] %s5166_s22 }
   0xa   :  { %27 = vsyncpa [#allocation4], 0 }
   0xb   :  { %28 = vsyncpa [#allocation7], 0 }
   0xc   :  { %29 = vsyncpa [#allocation10], 0 }
   0xd   :  { %30 = vsyncpa [#allocation5], 0  ;;  %s4422_s3 = smov [#allocation6]   ;;  %s4423_s29 = smov [#allocation9]  }
   0xe   :  { %s48_s28 = sshll.u32 %s4422_s3, 4  ;;  %s90_s30 = sshll.u32 %s4423_s29, 4  ;;  %s49_s28 = int_to_ptr.vmem [resolvable:$true] %s48_s28  ;;  %s4560_s30 = int_to_ptr.vmem [resolvable:$true] %s90_s30 }
   0xf   :  { %s5181_s23 = sld [smem:[#allocation18_spill]] }
  0x15   :  { %s4282_s1 = scalar_lea.hbm %s5181_s23, 256 }
  0x16   :  { %p4283_p0 = scmp.ne.s32.totalorder %s5181_s23, %s4282_s1  ;;  %p4286_p1 = scmp.lt.u32.totalorder %s4282_s1, %s5181_s23 }
  0x18   :  { %p4288_p2 = pnand %p4286_p1, %p4283_p0 }
  0x1a   :  { %4291 = shalt.err (!%p4288_p2)
}
  0x1b   :  { %s4292_s26 = scalar_lea.vmem %s49_s28, 256  ;;  %p4297_p4 = scmp.lt.s32.totalorder %s49_s28, %s49_s28 }
  0x1c   :  { %p4293_p3 = scmp.ne.s32.totalorder %s49_s28, %s4292_s26  ;;  %p4298_p5 = scmp.lt.s32.totalorder %s4292_s26, %s4292_s26 }
  0x1e   :  { %p4299_p6 = por %p4298_p5, %p4297_p4 }
  0x20   :  { %p4300_p7 = pnand %p4299_p6, %p4293_p3 }
  0x22   :  { %4303 = shalt.err (!%p4300_p7)
}
  0x23   :  { %s4424_s2 = smov 128   ;;  %s4425_s27 = smov 8  }
  0x24   :  { %54 = dma.hbm_to_vmem [thread:$0]  %s5181_s23, 256, %s49_s28, [#allocation7], %s4424_s2, %s4424_s2, %s4425_s27  }
  0x25   :  { %s4304_s1 = scalar_lea.hbm %s5156_s12, 512 }
  0x26   :  { %p4305_p8 = scmp.ne.s32.totalorder %s5156_s12, %s4304_s1  ;;  %p4308_p9 = scmp.lt.u32.totalorder %s4304_s1, %s5156_s12 }
  0x28   :  { %p4310_p10 = pnand %p4308_p9, %p4305_p8 }
  0x2a   :  { %4313 = shalt.err (!%p4310_p10)
}
  0x2b   :  { %s4314_s26 = scalar_lea.vmem %s4560_s30, 512  ;;  %p4319_p12 = scmp.lt.s32.totalorder %s4560_s30, %s4560_s30 }
  0x2c   :  { %p4315_p11 = scmp.ne.s32.totalorder %s4560_s30, %s4314_s26  ;;  %p4320_p13 = scmp.lt.s32.totalorder %s4314_s26, %s4314_s26 }
  0x2e   :  { %p4321_p0 = por %p4320_p13, %p4319_p12 }
  0x30   :  { %p4322_p1 = pnand %p4321_p0, %p4315_p11 }
  0x32   :  { %4325 = shalt.err (!%p4322_p1)
}
  0x33   :  { %96 = dma.hbm_to_vmem [thread:$0]  %s5156_s12, 512, %s4560_s30, [#allocation10], %s4424_s2, %s4424_s2, %s4425_s27  }
  0x34   :  { %s4426_s3 = smov [#allocation3]   ;;  %s4427_s4 = smov [#allocation8]  }
  0x35   :  { %s36_s29 = sshll.u32 %s4426_s3, 4  ;;  %s76_s0 = sshll.u32 %s4427_s4, 4  ;;  %s37_s29 = int_to_ptr.vmem [resolvable:$true] %s36_s29  ;;  %s4597_s0 = int_to_ptr.vmem [resolvable:$true] %s76_s0 }
  0x36   :  { %s5182_s24 = sld [smem:[#allocation17_spill]] }
  0x3c   :  { %s4326_s6 = scalar_lea.hbm %s5182_s24, 256 }
  0x3d   :  { %p4327_p2 = scmp.ne.s32.totalorder %s5182_s24, %s4326_s6  ;;  %p4330_p3 = scmp.lt.u32.totalorder %s4326_s6, %s5182_s24 }
  0x3f   :  { %p4332_p4 = pnand %p4330_p3, %p4327_p2 }
  0x41   :  { %4335 = shalt.err (!%p4332_p4)
}
  0x42   :  { %s4336_s12 = scalar_lea.vmem %s37_s29, 256  ;;  %p4341_p6 = scmp.lt.s32.totalorder %s37_s29, %s37_s29 }
  0x43   :  { %p4337_p5 = scmp.ne.s32.totalorder %s37_s29, %s4336_s12  ;;  %p4342_p7 = scmp.lt.s32.totalorder %s4336_s12, %s4336_s12 }
  0x45   :  { %p4343_p8 = por %p4342_p7, %p4341_p6 }
  0x47   :  { %p4344_p9 = pnand %p4343_p8, %p4337_p5 }
  0x49   :  { %4347 = shalt.err (!%p4344_p9)
}
  0x4a   :  { %42 = dma.hbm_to_vmem [thread:$0]  %s5182_s24, 256, %s37_s29, [#allocation4], %s4424_s2, %s4424_s2, %s4425_s27  }
  0x4b   :  { %s4348_s21 = scalar_lea.hbm %s5154_s10, 512 }
  0x4c   :  { %p4349_p10 = scmp.ne.s32.totalorder %s5154_s10, %s4348_s21  ;;  %p4352_p11 = scmp.lt.u32.totalorder %s4348_s21, %s5154_s10 }
  0x4e   :  { %p4354_p12 = pnand %p4352_p11, %p4349_p10 }
  0x50   :  { %4357 = shalt.err (!%p4354_p12)
}
  0x51   :  { %s4358_s6 = scalar_lea.vmem %s4597_s0, 512  ;;  %p4363_p0 = scmp.lt.s32.totalorder %s4597_s0, %s4597_s0 }
  0x52   :  { %p4359_p13 = scmp.ne.s32.totalorder %s4597_s0, %s4358_s6  ;;  %p4364_p1 = scmp.lt.s32.totalorder %s4358_s6, %s4358_s6 }
  0x54   :  { %p4365_p2 = por %p4364_p1, %p4363_p0 }
  0x56   :  { %p4366_p3 = pnand %p4365_p2, %p4359_p13 }
  0x58   :  { %4369 = shalt.err (!%p4366_p3)
}
  0x59   :  { %82 = dma.hbm_to_vmem [thread:$0]  %s5154_s10, 512, %s4597_s0, [#allocation7], %s4424_s2, %s4424_s2, %s4425_s27  }
  0x5a   :  { %s4428_s25 = smov [#allocation11]   ;;  %s4370_s28 = scalar_lea.hbm %s5160_s16, 512 }
  0x5b   :  { %s108_s26 = sshll.u32 %s4428_s25, 4  ;;  %p4371_p4 = scmp.ne.s32.totalorder %s5160_s16, %s4370_s28  ;;  %s109_s26 = int_to_ptr.vmem [resolvable:$true] %s108_s26 }
  0x5c   :  { %p4374_p5 = scmp.lt.u32.totalorder %s4370_s28, %s5160_s16 }
  0x5e   :  { %p4376_p6 = pnand %p4374_p5, %p4371_p4 }
  0x60   :  { %4379 = shalt.err (!%p4376_p6)
}
  0x61   :  { %s4380_s4 = scalar_lea.vmem %s109_s26, 512  ;;  %p4385_p8 = scmp.lt.s32.totalorder %s109_s26, %s109_s26 }
  0x62   :  { %p4381_p7 = scmp.ne.s32.totalorder %s109_s26, %s4380_s4  ;;  %p4386_p9 = scmp.lt.s32.totalorder %s4380_s4, %s4380_s4 }
  0x64   :  { %p4387_p10 = por %p4386_p9, %p4385_p8 }
  0x66   :  { %p4388_p11 = pnand %p4387_p10, %p4381_p7 }
  0x68   :  { %4391 = shalt.err (!%p4388_p11)
}
  0x69   :  { %114 = dma.hbm_to_vmem [thread:$0]  %s5160_s16, 512, %s109_s26, [#allocation10], %s4424_s2, %s4424_s2, %s4425_s27  }
  0x6a   :  { %4414 = dma.done.wait [#allocation4], 256  }
  0x6b   :  { %4415 = vsyncadd [#allocation4], 4294967040 }
  0x6c   :  { %4416 = dma.done.wait [#allocation7], 768  }
  0x6d   :  { %4417 = vsyncadd [#allocation7], 4294966528 }
  0x6e   :  { %4418 = dma.done.wait [#allocation10], 1024  }
  0x6f   :  { %4419 = vsyncadd [#allocation10], 4294966272  ;;  %vm160_vm0 = vcmask 261120   ;;  %s5183_s6 = sld [smem:[#allocation19_spill]]  ;;  %v4661_v5 = vld [vmem:[#allocation3] sm:$0xff]  ;;  %v4665_v7 = vld [vmem:[#allocation3 + $0x8] sm:$0xff]  ;;  %v144_v29 = vlaneseq }
  0x70   :  { %3882 = vmatprep.mubr.msk.f32.mxu1 %vm160_vm0, %v4661_v5  ;;  %v4429_v8 = vmov 0.0   ;;  %vm4430_vm1 = vmmov 0   ;;  %s5184_s23 = sld [smem:[#allocation20_spill]]  ;;  %s4431_s3 = smov 120   ;;  %vm245_vm2 = vcmask 64512   ;;  %vm581_vm4 = vcmask 130112  }
  0x71   :  { %3895 = vmatprep.subr.mxu0 %v4429_v8  ;;  %3897 = vmatprep.mubr.msk.f32.mxu0 %vm4430_vm1, %v4429_v8  ;;  %s4432_s21 = smov 96   ;;  %s4433_s22 = smov 80   ;;  %v145_v30 = vshrl.u32 %v144_v29, 7  ;;  %v147_v31 = vand.u32 127, %v144_v29  ;;  %vm754_vm5 = vcmask 195712   ;;  %vm927_vm6 = vcmask 261312  }
  0x72   :  { %s4434_s4 = smov 88   ;;  %s4435_s10 = smov 72   ;;  %vm3540_vm7 = vcmask 523264  }
  0x73   :  { %s4436_s0 = smov 112   ;;  %s4437_s1 = smov 104   ;;  %vm4754_vm3 = vcmp.ge.s32.totalorder %v145_v30, %v147_v31 }
  0x74   :  { %s4438_s5 = smov 56   ;;  %s4440_s29 = smov 40  }
  0x75   :  { %v149_v0 = vld [vmem:[%s5183_s6] sm:$0xff]  ;;  %v150_v1 = vld [vmem:[%s5183_s6 + $0x8] sm:$0xff]  ;;  %v151_v2 = vld [vmem:[%s5183_s6 + $0x10] sm:$0xff]  ;;  %s4441_s24 = smov 48   ;;  %s4442_s25 = smov 16  }
  0x76   :  { %v4119_v3 = vpack.c.bf16 %v150_v1, %v149_v0  ;;  %v152_v4 = vld [vmem:[%s5183_s6 + $0x18] sm:$0xff]  ;;  %v3689_v9 = vld [vmem:[%s5184_s23] ss:$0 sm:$0xff]  ;;  %s4439_s6 = smov 64   ;;  %s4443_s12 = smov 24  }
  0x77   :  { %v4123_v6 = vpack.c.bf16 %v152_v4, %v151_v2  ;;  %s5187_s30 = sld [smem:[#allocation21_spill]]  ;;  %s5188_s16 = sld [smem:[#allocation22_spill]] }
  0x78   :  { %4120 = vmatprep.subr.bf16.mxu1 %v4119_v3  ;;  %s5189_s23 = sld [smem:[#allocation23_spill]] }
  0x79   :  { %4122 = vmatpush3.bf16.msra.mxu1 %v4119_v3 }
  0x7a   :  { %4124 = vmatprep.subr.bf16.mxu1 %v4123_v6 }
  0x7d   :  { %4126 = vmatpush3.bf16.msra.mxu1 %v4123_v6 }
  0x7e   :  { %3885 = vmatprep.subr.mxu1 %v4429_v8 }
  0x80   :  { %3883 = vmatmul.mubr.msk.f32.vlgmr.msra.gmra.mrb[0].mxu1 %vm160_vm0, %v4665_v7 }
  0x81   :  { %3887 = vmatprep.mubr.msk.f32.mxu1 %vm4430_vm1, %v4429_v8 }
 0x153   :  { %v3884_v10 = vpop.f32.mrb[0].mxu1 }
 0x154   :  { %v233_v11 = vpop.f32.mrb[1].mxu1  ;;  %v4692_v13 = vadd.f32 %v3884_v10, %v3689_v9 }
 0x155   :  { %v4678_v12 = vadd.f32 %v3689_v9, %v233_v11 }
 0x157   :  { %410 = vrot.lane.b32.xlu1 %v4678_v12, %s4431_s3  ;;  %243 = vrot.lane.b32.xlu0 %v4678_v12, %s4432_s21 }
 0x15b   :  { %585 = vrot.lane.b32.xlu1 %v4678_v12, %s4433_s22  ;;  %412 = vrot.lane.b32.xlu0 %v4678_v12, %s4434_s4 }
 0x15f   :  { %758 = vrot.lane.b32.xlu1 %v4678_v12, %s4435_s10  ;;  %583 = vrot.lane.b32.xlu0 %v4678_v12, %s4436_s0 }
 0x163   :  { %930 = vrot.lane.b32.xlu1 %v4692_v13, %s4432_s21  ;;  %756 = vrot.lane.b32.xlu0 %v4678_v12, %s4437_s1 }
 0x167   :  { %1096 = vrot.lane.b32.xlu1 %v4692_v13, %s4431_s3  ;;  %1098 = vrot.lane.b32.xlu0 %v4692_v13, %s4434_s4 }
 0x16b   :  { %1268 = vrot.lane.b32.xlu1 %v4692_v13, %s4436_s0  ;;  %1270 = vrot.lane.b32.xlu0 %v4692_v13, %s4433_s22 }
 0x16f   :  { %1440 = vrot.lane.b32.xlu1 %v4692_v13, %s4437_s1  ;;  %1442 = vrot.lane.b32.xlu0 %v4692_v13, %s4435_s10 }
 0x173   :  { %501 = vrot.lane.b32.xlu1 %v4678_v12, %s4438_s5  ;;  %333 = vrot.lane.b32.xlu0 %v4678_v12, %s4439_s6 }
 0x1c9   :  { %v411_v14 = vpop.permute.xlu1 %410  ;;  %v244_v15 = vpop.permute.xlu0 %243 }
 0x1ca   :  { %3886 = vmatpush3.xpose.msk.msra.mxu1 %vm245_vm2, %v244_v15 }
 0x1cb   :  { %3890 = vmatprep.subr.mxu1 %v4429_v8 }
 0x1cd   :  { %v586_v16 = vpop.permute.xlu1 %585  ;;  %3888 = vmatmul.mubr.msk.f32.vlgmr.msra.gmra.mrb[2].mxu1 %vm245_vm2, %v4678_v12  ;;  %v413_v17 = vpop.permute.xlu0 %412 }
 0x1ce   :  { %3896 = vmatpush3.xpose.msk.msra.mxu0 %vm245_vm2, %v413_v17  ;;  %3892 = vmatprep.mubr.msk.f32.mxu1 %vm4430_vm1, %v4429_v8 }
 0x1cf   :  { %3905 = vmatprep.subr.mxu0 %v4429_v8 }
 0x1d1   :  { %v759_v18 = vpop.permute.xlu1 %758  ;;  %3898 = vmatmul.mubr.msk.f32.vlgmr.msra.gmra.mrb[0].mxu0 %vm245_vm2, %v411_v14  ;;  %v584_v19 = vpop.permute.xlu0 %583 }
 0x1d2   :  { %3906 = vmatpush3.xpose.msk.msra.mxu0 %vm245_vm2, %v586_v16  ;;  %3907 = vmatprep.mubr.msk.f32.mxu0 %vm4430_vm1, %v4429_v8 }
 0x1d3   :  { %3915 = vmatprep.subr.mxu0 %v4429_v8 }
 0x1d5   :  { %3908 = vmatmul.mubr.msk.f32.vlgmr.msra.gmra.mrb[2].mxu0 %vm245_vm2, %v584_v19  ;;  %v757_v20 = vpop.permute.xlu0 %756  ;;  %v931_v21 = vpop.permute.xlu1 %930 }
 0x1d6   :  { %3916 = vmatpush3.xpose.msk.msra.mxu0 %vm245_vm2, %v759_v18  ;;  %3917 = vmatprep.mubr.msk.f32.mxu0 %vm4430_vm1, %v4429_v8 }
 0x1d7   :  { %3925 = vmatprep.subr.mxu0 %v4429_v8 }
 0x1d9   :  { %3918 = vmatmul.mubr.msk.f32.vlgmr.msra.gmra.mrb[4].mxu0 %vm245_vm2, %v757_v20  ;;  %v1099_v22 = vpop.permute.xlu0 %1098  ;;  %v1097_v23 = vpop.permute.xlu1 %1096 }
 0x1da   :  { %3926 = vmatpush3.xpose.msk.msra.mxu0 %vm245_vm2, %v931_v21  ;;  %3927 = vmatprep.mubr.msk.f32.mxu0 %vm4430_vm1, %v4429_v8 }
 0x1db   :  { %3935 = vmatprep.subr.mxu0 %v4429_v8 }
 0x1dd   :  { %3928 = vmatmul.mubr.msk.f32.vlgmr.msra.gmra.mrb[6].mxu0 %vm245_vm2, %v4692_v13  ;;  %v1271_v24 = vpop.permute.xlu0 %1270  ;;  %v1269_v26 = vpop.permute.xlu1 %1268 }
 0x1de   :  { %3936 = vmatpush3.xpose.msk.msra.mxu0 %vm245_vm2, %v1099_v22  ;;  %3937 = vmatprep.mubr.msk.f32.mxu0 %vm4430_vm1, %v4429_v8 }
 0x1df   :  { %3945 = vmatprep.subr.mxu0 %v4429_v8 }
 0x1e1   :  { %3938 = vmatmul.mubr.msk.f32.vlgmr.msra.gmra.mrb[8].mxu0 %vm245_vm2, %v1097_v23  ;;  %v1443_v25 = vpop.permute.xlu0 %1442  ;;  %v1441_v28 = vpop.permute.xlu1 %1440 }
 0x1e2   :  { %3946 = vmatpush3.xpose.msk.msra.mxu0 %vm245_vm2, %v1271_v24  ;;  %3947 = vmatprep.mubr.msk.f32.mxu0 %vm4430_vm1, %v4429_v8 }
 0x1e3   :  { %3955 = vmatprep.subr.mxu0 %v4429_v8 }
 0x1e5   :  { %3948 = vmatmul.mubr.msk.f32.vlgmr.msra.gmra.mrb[10].mxu0 %vm245_vm2, %v1269_v26  ;;  %v334_v27 = vpop.permute.xlu0 %333  ;;  %v4786_v14 = vpop.permute.xlu1 %501 }
 0x1e6   :  { %3891 = vmatpush3.msra.mxu1 %v334_v27  ;;  %3956 = vmatpush3.xpose.msk.msra.mxu0 %vm245_vm2, %v1443_v25 }
 0x1e7   :  { %3957 = vmatprep.mubr.msk.f32.mxu0 %vm4430_vm1, %v4429_v8  ;;  %3900 = vmatprep.subr.mxu1 %v4429_v8 }
 0x1e9   :  { %3958 = vmatmul.mubr.msk.f32.vlgmr.msra.gmra.mrb[12].mxu0 %vm245_vm2, %v1441_v28 }
 0x2a0   :  { %v316_v32 = vpop.f32.mrb[2].mxu1 }
 0x2a1   :  { %v320_v34 = vmul.f32 0.35355338, %v316_v32  ;;  %v3889_v35 = vpop.f32.mrb[3].mxu1 }
 0x2a3   :  { %v321_v36 = vsel %vm4754_vm3, %v320_v34, -1e+09 }
 0x2a4   :  { %v484_v37 = vpop.f32.mrb[0].mxu0  ;;  %v322_v38 = vsel %vm245_vm2, %v321_v36, -inf }
 0x2a5   :  { %v488_v39 = vmul.f32 0.35355338, %v484_v37  ;;  %323 = vmax.xlane.f32.xlu0 %v322_v38  ;;  %v3899_v40 = vpop.f32.mrb[1].mxu0 }
 0x2a7   :  { %v489_v41 = vsel %vm4754_vm3, %v488_v39, -1e+09 }
 0x2a8   :  { %v657_v42 = vpop.f32.mrb[2].mxu0  ;;  %v490_v43 = vsel %vm245_vm2, %v489_v41, -inf }
 0x2a9   :  { %v661_v44 = vmul.f32 0.35355338, %v657_v42  ;;  %491 = vmax.xlane.f32.xlu1 %v490_v43  ;;  %v3909_v45 = vpop.f32.mrb[3].mxu0 }
 0x2ab   :  { %v662_v46 = vsel %vm4754_vm3, %v661_v44, -1e+09 }
 0x2ac   :  { %v830_v47 = vpop.f32.mrb[4].mxu0  ;;  %v663_v48 = vsel %vm245_vm2, %v662_v46, -inf }
 0x2ad   :  { %v834_v49 = vmul.f32 0.35355338, %v830_v47  ;;  %664 = vmax.xlane.f32.xlu0 %v663_v48  ;;  %v3919_v50 = vpop.f32.mrb[5].mxu0 }
 0x2af   :  { %v835_v51 = vsel %vm4754_vm3, %v834_v49, -1e+09 }
 0x2b0   :  { %v1002_v52 = vpop.f32.mrb[6].mxu0  ;;  %v836_v53 = vsel %vm245_vm2, %v835_v51, -inf }
 0x2b1   :  { %v1006_v54 = vmul.f32 0.35355338, %v1002_v52  ;;  %837 = vmax.xlane.f32.xlu0 %v836_v53  ;;  %v3929_v55 = vpop.f32.mrb[7].mxu0 }
 0x2b3   :  { %v1007_v56 = vsel %vm4754_vm3, %v1006_v54, -1e+09 }
 0x2b4   :  { %v1170_v57 = vpop.f32.mrb[8].mxu0  ;;  %v1008_v58 = vsel %vm245_vm2, %v1007_v56, -inf }
 0x2b5   :  { %v1174_v59 = vmul.f32 0.35355338, %v1170_v57  ;;  %1009 = vmax.xlane.f32.xlu1 %v1008_v58  ;;  %v3939_v60 = vpop.f32.mrb[9].mxu0 }
 0x2b7   :  { %v1175_v61 = vsel %vm4754_vm3, %v1174_v59, -1e+09 }
 0x2b8   :  { %v1342_v62 = vpop.f32.mrb[10].mxu0  ;;  %v1176_v63 = vsel %vm245_vm2, %v1175_v61, -inf }
 0x2b9   :  { %v1346_v0 = vmul.f32 0.35355338, %v1342_v62  ;;  %1177 = vmax.xlane.f32.xlu0 %v1176_v63  ;;  %v3949_v1 = vpop.f32.mrb[11].mxu0 }
 0x2bb   :  { %v1347_v2 = vsel %vm4754_vm3, %v1346_v0, -1e+09 }
 0x2bc   :  { %v1514_v3 = vpop.f32.mrb[12].mxu0  ;;  %v1348_v4 = vsel %vm245_vm2, %v1347_v2, -inf }
 0x2bd   :  { %v1518_v6 = vmul.f32 0.35355338, %v1514_v3  ;;  %1349 = vmax.xlane.f32.xlu1 %v1348_v4  ;;  %v3959_v9 = vpop.f32.mrb[13].mxu0 }
 0x2bf   :  { %v1519_v10 = vsel %vm4754_vm3, %v1518_v6, -1e+09 }
 0x2c0   :  { %v1520_v11 = vsel %vm245_vm2, %v1519_v10, -inf }
 0x2c1   :  { %1521 = vmax.xlane.f32.xlu0 %v1520_v11 }
 0x2ce   :  { %847 = vrot.lane.b32.xlu1 %v4678_v12, %s4440_s29 }
 0x2d7   :  { %674 = vrot.lane.b32.xlu0 %v4678_v12, %s4441_s24 }
 0x332   :  { %v324_v15 = vpop.xlane.xlu0 %323 }
 0x333   :  { %v325_v16 = vsub.f32 %v321_v36, %v324_v15 }
 0x335   :  { %v326_v17 = vmul.f32 1.442695, %v325_v16 }
 0x336   :  { %v492_v18 = vpop.xlane.xlu1 %491 }
 0x337   :  { %4206 = vpow2.f32 %v326_v17  ;;  %v493_v19 = vsub.f32 %v489_v41, %v492_v18 }
 0x339   :  { %v494_v20 = vmul.f32 1.442695, %v493_v19 }
 0x33a   :  { %v665_v21 = vpop.xlane.xlu0 %664 }
 0x33b   :  { %4208 = vpow2.f32 %v494_v20  ;;  %v666_v22 = vsub.f32 %v662_v46, %v665_v21 }
 0x33d   :  { %v667_v23 = vmul.f32 1.442695, %v666_v22 }
 0x33e   :  { %v838_v24 = vpop.xlane.xlu0 %837 }
 0x33f   :  { %4210 = vpow2.f32 %v667_v23  ;;  %v839_v25 = vsub.f32 %v835_v51, %v838_v24 }
 0x341   :  { %v4207_v26 = vpop.eup %4206  ;;  %v840_v27 = vmul.f32 1.442695, %v839_v25 }
 0x342   :  { %v328_v12 = vsel %vm245_vm2, %v4207_v26, 0.0  ;;  %v1010_v34 = vpop.xlane.xlu1 %1009 }
 0x343   :  { %4212 = vpow2.f32 %v840_v27  ;;  %329 = vadd.xlane.f32.xlu1 %v328_v12  ;;  %v1011_v35 = vsub.f32 %v1007_v56, %v1010_v34 }
 0x345   :  { %v4209_v28 = vpop.eup %4208  ;;  %v1012_v39 = vmul.f32 1.442695, %v1011_v35 }
 0x346   :  { %v496_v29 = vsel %vm245_vm2, %v4209_v28, 0.0  ;;  %v1178_v36 = vpop.xlane.xlu0 %1177 }
 0x347   :  { %497 = vadd.xlane.f32.xlu0 %v496_v29  ;;  %v1179_v38 = vsub.f32 %v1175_v61, %v1178_v36  ;;  %4214 = vpow2.f32 %v1012_v39  ;;  %v1616_v36 = vld [vmem:[%s5187_s30 + $0x10] sm:$0xff] }
 0x349   :  { %v4211_v30 = vpop.eup %4210  ;;  %v1180_v42 = vmul.f32 1.442695, %v1179_v38 }
 0x34a   :  { %v669_v31 = vsel %vm245_vm2, %v4211_v30, 0.0  ;;  %v1350_v37 = vpop.xlane.xlu1 %1349 }
 0x34b   :  { %670 = vadd.xlane.f32.xlu1 %v669_v31  ;;  %v1351_v40 = vsub.f32 %v1347_v2, %v1350_v37  ;;  %4216 = vpow2.f32 %v1180_v42  ;;  %v1614_v31 = vld [vmem:[%s5187_s30] sm:$0xff]  ;;  %v1617_v37 = vld [vmem:[%s5187_s30 + $0x18] sm:$0xff] }
 0x34c   :  { %v4131_v38 = vpack.c.bf16 %v1617_v37, %v1616_v36  ;;  %v1753_v42 = vld [vmem:[%s5152_s8] sm:$0xff] }
 0x34d   :  { %v4791_v32 = vpop.eup %4212  ;;  %v1352_v43 = vmul.f32 1.442695, %v1351_v40  ;;  %v3719_v36 = vld [vmem:[%s5189_s23] ss:$0 sm:$0xff] }
 0x34e   :  { %v842_v33 = vsel %vm245_vm2, %v4791_v32, 0.0  ;;  %v1522_v41 = vpop.xlane.xlu0 %1521  ;;  %v848_v54 = vpop.permute.xlu1 %847 }
 0x34f   :  { %843 = vadd.xlane.f32.xlu0 %v842_v33  ;;  %v1523_v44 = vsub.f32 %v1519_v10, %v1522_v41  ;;  %4218 = vpow2.f32 %v1352_v43  ;;  %v1754_v43 = vld [vmem:[%s5152_s8 + $0x8] sm:$0xff] }
 0x351   :  { %v1524_v45 = vmul.f32 1.442695, %v1523_v44  ;;  %v4215_v46 = vpop.eup %4214  ;;  %v1755_v44 = vld [vmem:[%s5152_s8 + $0x10] sm:$0xff] }
 0x352   :  { %v1014_v48 = vsel %vm245_vm2, %v4215_v46, 0.0  ;;  %v675_v55 = vpop.permute.xlu0 %674 }
 0x353   :  { %4220 = vpow2.f32 %v1524_v45 }
 0x355   :  { %v4799_v47 = vpop.eup %4216 }
 0x356   :  { %v1182_v51 = vsel %vm245_vm2, %v4799_v47, 0.0 }
 0x359   :  { %v4802_v49 = vpop.eup %4218 }
 0x35a   :  { %v1354_v50 = vsel %vm245_vm2, %v4802_v49, 0.0 }
 0x35c   :  { %1187 = vrot.lane.b32.xlu1 %v4692_v13, %s4438_s5 }
 0x35d   :  { %v4808_v52 = vpop.eup %4220 }
 0x35e   :  { %v1526_v53 = vsel %vm245_vm2, %v4808_v52, 0.0 }
 0x365   :  { %1019 = vrot.lane.b32.xlu0 %v4692_v13, %s4439_s6 }
 0x380   :  { %1015 = vadd.xlane.f32.xlu1 %v1014_v48  ;;  %v142_v48 = vld [vmem:[#allocation6] sm:$0xff] }
 0x384   :  { %1355 = vadd.xlane.f32.xlu1 %v1354_v50  ;;  %1183 = vadd.xlane.f32.xlu0 %v1182_v51 }
 0x388   :  { %1527 = vadd.xlane.f32.xlu1 %v1526_v53 }
 0x399   :  { %1531 = vrot.lane.b32.xlu1 %v4692_v13, %s4440_s29 }
 0x39a   :  { %1359 = vrot.lane.b32.xlu0 %v4692_v13, %s4441_s24 }
 0x3d0   :  { %v330_v56 = vpop.xlane.xlu1 %329 }
 0x3d1   :  { %4222 = vrcp.f32 %v330_v56 }
 0x3d4   :  { %v498_v57 = vpop.xlane.xlu0 %497 }
 0x3d5   :  { %4224 = vrcp.f32 %v498_v57 }
 0x3d8   :  { %v671_v58 = vpop.xlane.xlu1 %670 }
 0x3d9   :  { %4226 = vrcp.f32 %v671_v58 }
 0x3db   :  { %v4223_v59 = vpop.eup %4222 }
 0x3dc   :  { %v332_v60 = vmul.f32 %v4223_v59, %v4207_v26  ;;  %v844_v61 = vpop.xlane.xlu0 %843  ;;  %v1188_v4 = vpop.permute.xlu1 %1187 }
 0x3dd   :  { %4228 = vrcp.f32 %v844_v61 }
 0x3de   :  { %3893 = vmatmul.mubr.msk.f32.vlgmr.msra.gmra.mrb[4].mxu1 %vm245_vm2, %v332_v60 }
 0x3df   :  { %v4225_v62 = vpop.eup %4224  ;;  %3901 = vmatpush3.msra.mxu1 %v4786_v14  ;;  %3902 = vmatprep.mubr.msk.f32.mxu1 %vm4430_vm1, %v4429_v8 }
 0x3e0   :  { %v500_v13 = vmul.f32 %v4225_v62, %v4209_v28  ;;  %3910 = vmatprep.subr.mxu1 %v4429_v8  ;;  %v1020_v3 = vpop.permute.xlu0 %1019 }
 0x3e2   :  { %3903 = vmatmul.mubr.msk.f32.vlgmr.msra.gmra.mrb[6].mxu1 %vm245_vm2, %v500_v13  ;;  %v3716_v13 = vld [vmem:[%s5188_s16] ss:$0 sm:$0xff] }
 0x3e3   :  { %v4227_v63 = vpop.eup %4226  ;;  %3911 = vmatpush3.msra.mxu1 %v675_v55  ;;  %3912 = vmatprep.mubr.msk.f32.mxu1 %vm4430_vm1, %v4429_v8 }
 0x3e4   :  { %v673_v0 = vmul.f32 %v4227_v63, %v4211_v30  ;;  %3920 = vmatprep.subr.mxu1 %v4429_v8 }
 0x3e6   :  { %3913 = vmatmul.mubr.msk.f32.vlgmr.msra.gmra.mrb[8].mxu1 %vm245_vm2, %v673_v0 }
 0x3e7   :  { %v4229_v1 = vpop.eup %4228  ;;  %3921 = vmatpush3.msra.mxu1 %v848_v54  ;;  %3922 = vmatprep.mubr.msk.f32.mxu1 %vm4430_vm1, %v4429_v8 }
 0x3e8   :  { %v846_v2 = vmul.f32 %v4229_v1, %v4791_v32  ;;  %3930 = vmatprep.subr.mxu1 %v4429_v8  ;;  %v1615_v32 = vld [vmem:[%s5187_s30 + $0x8] sm:$0xff] }
 0x3e9   :  { %v4127_v34 = vpack.c.bf16 %v1615_v32, %v1614_v31 }
 0x3ea   :  { %3923 = vmatmul.mubr.msk.f32.vlgmr.msra.gmra.mrb[10].mxu1 %vm245_vm2, %v846_v2 }
 0x3eb   :  { %3931 = vmatpush3.msra.mxu1 %v1020_v3  ;;  %3932 = vmatprep.mubr.msk.f32.mxu1 %vm4430_vm1, %v4429_v8 }
 0x3ec   :  { %3940 = vmatprep.subr.mxu1 %v4429_v8  ;;  %4128 = vmatprep.subr.bf16.mxu0 %v4127_v34 }
 0x3ed   :  { %4130 = vmatpush3.bf16.msra.mxu0 %v4127_v34 }
 0x3ee   :  { %4132 = vmatprep.subr.bf16.mxu0 %v4131_v38 }
 0x3f1   :  { %4134 = vmatpush3.bf16.msra.mxu0 %v4131_v38 }
 0x40d   :  { %v1016_v6 = vpop.xlane.xlu1 %1015 }
 0x40e   :  { %4230 = vrcp.f32 %v1016_v6 }
 0x411   :  { %v1356_v9 = vpop.xlane.xlu1 %1355  ;;  %v1184_v10 = vpop.xlane.xlu0 %1183 }
 0x412   :  { %4232 = vrcp.f32 %v1184_v10  ;;  %v3721_v10 = vld [vmem:[%s5153_s9] ss:$0 sm:$0xff] }
 0x413   :  { %4234 = vrcp.f32 %v1356_v9 }
 0x415   :  { %v1528_v11 = vpop.xlane.xlu1 %1527  ;;  %v1360_v19 = vpop.permute.xlu0 %1359 }
 0x416   :  { %4236 = vrcp.f32 %v1528_v11 }
 0x418   :  { %v4231_v14 = vpop.eup %4230 }
 0x419   :  { %v1018_v15 = vmul.f32 %v4231_v14, %v4215_v46  ;;  %v1532_v22 = vpop.permute.xlu1 %1531  ;;  %v4135_v46 = vpack.c.bf16 %v1754_v43, %v1753_v42 }
 0x41b   :  { %3933 = vmatmul.mubr.msk.f32.vlgmr.msra.gmra.mrb[12].mxu1 %vm245_vm2, %v1018_v15 }
 0x41c   :  { %3941 = vmatpush3.msra.mxu1 %v1188_v4  ;;  %3942 = vmatprep.mubr.msk.f32.mxu1 %vm4430_vm1, %v4429_v8  ;;  %v4233_v16 = vpop.eup %4232 }
 0x41d   :  { %3950 = vmatprep.subr.mxu1 %v4429_v8  ;;  %v1186_v17 = vmul.f32 %v4233_v16, %v4799_v47  ;;  %v4235_v18 = vpop.eup %4234  ;;  %v1756_v47 = vld [vmem:[%s5152_s8 + $0x18] sm:$0xff] }
 0x41e   :  { %v1358_v20 = vmul.f32 %v4235_v18, %v4802_v49  ;;  %v4139_v49 = vpack.c.bf16 %v1756_v47, %v1755_v44 }
 0x41f   :  { %3943 = vmatmul.mubr.msk.f32.vlgmr.msra.gmra.mrb[14].mxu1 %vm245_vm2, %v1186_v17 }
 0x420   :  { %3951 = vmatpush3.msra.mxu1 %v1360_v19  ;;  %3952 = vmatprep.mubr.msk.f32.mxu1 %vm4430_vm1, %v4429_v8  ;;  %v4237_v21 = vpop.eup %4236 }
 0x421   :  { %3960 = vmatprep.subr.mxu1 %v4429_v8  ;;  %v1530_v23 = vmul.f32 %v4237_v21, %v4808_v52  ;;  %v143_v52 = vld [vmem:[#allocation6 + $0x8] sm:$0xff] }
 0x423   :  { %3953 = vmatmul.mubr.msk.f32.vlgmr.msra.gmra.mrb[16].mxu1 %vm245_vm2, %v1358_v20 }
 0x424   :  { %3961 = vmatpush3.msra.mxu1 %v1532_v22  ;;  %3962 = vmatprep.mubr.msk.f32.mxu1 %vm4430_vm1, %v4429_v8 }
 0x425   :  { %4136 = vmatprep.subr.bf16.mxu1 %v4135_v46 }
 0x427   :  { %3963 = vmatmul.mubr.msk.f32.vlgmr.msra.gmra.mrb[18].mxu1 %vm245_vm2, %v1530_v23 }
 0x428   :  { %3984 = vmatprep.mubr.msk.f32.mxu1 %vm160_vm0, %v142_v48  ;;  %4138 = vmatpush3.bf16.msra.mxu1 %v4135_v46 }
 0x429   :  { %4140 = vmatprep.subr.bf16.mxu1 %v4139_v49 }
 0x42c   :  { %4142 = vmatpush3.bf16.msra.mxu1 %v4139_v49 }
 0x42d   :  { %3998 = vmatprep.subr.mxu1 %v4429_v8 }
 0x42f   :  { %3985 = vmatmul.mubr.msk.f32.vlgmr.msra.gmra.mrb[20].mxu1 %vm160_vm0, %v143_v52 }
 0x430   :  { %4000 = vmatprep.mubr.msk.f32.mxu1 %vm4430_vm1, %v4429_v8 }
 0x4b1   :  { %v405_v24 = vpop.f32.mrb[4].mxu1 }
 0x4b2   :  { %409 = vst.msk [vmem:[#allocation2] sm:$0xff] %vm245_vm2, %v405_v24  ;;  %v3894_v25 = vpop.f32.mrb[5].mxu1  ;;  %v1845_v24 = vld [vmem:[#allocation8] sm:$0xff] }
 0x4b3   :  { %v1846_v25 = vld [vmem:[#allocation8 + $0x8] sm:$0xff] }
 0x4b5   :  { %v573_v26 = vpop.f32.mrb[6].mxu1 }
 0x4b6   :  { %578 = vrot.lane.b32.xlu0 %v573_v26, %s4425_s27  ;;  %v3904_v27 = vpop.f32.mrb[7].mxu1  ;;  %v4143_v26 = vpack.c.bf16 %v1846_v25, %v1845_v24 }
 0x4b7   :  { %v1847_v27 = vld [vmem:[#allocation8 + $0x10] sm:$0xff] }
 0x4b8   :  { %4144 = vmatprep.subr.bf16.mxu0 %v4143_v26 }
 0x4b9   :  { %v746_v12 = vpop.f32.mrb[8].mxu1 }
 0x4ba   :  { %751 = vrot.lane.b32.xlu1 %v746_v12, %s4442_s25  ;;  %v3914_v28 = vpop.f32.mrb[9].mxu1  ;;  %v1848_v12 = vld [vmem:[#allocation8 + $0x18] sm:$0xff] }
 0x4bb   :  { %v4147_v28 = vpack.c.bf16 %v1848_v12, %v1847_v27 }
 0x4bd   :  { %v919_v29 = vpop.f32.mrb[10].mxu1 }
 0x4be   :  { %924 = vrot.lane.b32.xlu1 %v919_v29, %s4443_s12  ;;  %v3924_v30 = vpop.f32.mrb[11].mxu1 }
 0x4ee   :  { %v1091_v33 = vpop.f32.mrb[12].mxu1 }
 0x4ef   :  { %1095 = vst.msk [vmem:[#allocation2 + $0x8] sm:$0xff] %vm245_vm2, %v1091_v33  ;;  %v3934_v35 = vpop.f32.mrb[13].mxu1 }
 0x4f2   :  { %v1259_v39 = vpop.f32.mrb[14].mxu1 }
 0x4f3   :  { %1264 = vrot.lane.b32.xlu0 %v1259_v39, %s4425_s27  ;;  %v3944_v40 = vpop.f32.mrb[15].mxu1  ;;  %v3720_v39 = vld [vmem:[%s5151_s7] ss:$0 sm:$0xff] }
 0x4f6   :  { %v1431_v41 = vpop.f32.mrb[16].mxu1 }
 0x4f7   :  { %1436 = vrot.lane.b32.xlu0 %v1431_v41, %s4442_s25  ;;  %v3954_v45 = vpop.f32.mrb[17].mxu1 }
 0x4fa   :  { %v1603_v50 = vpop.f32.mrb[18].mxu1 }
 0x4fb   :  { %1608 = vrot.lane.b32.xlu1 %v1603_v50, %s4443_s12  ;;  %v3964_v51 = vpop.f32.mrb[19].mxu1 }
 0x502   :  { %v3986_v61 = vpop.f32.mrb[20].mxu1 }
 0x503   :  { %v1836_v62 = vpop.f32.mrb[21].mxu1 }
 0x504   :  { %v1837_v11 = vadd.f32 %v3721_v10, %v1836_v62  ;;  %v3724_v62 = vld [vmem:[%s5155_s11] ss:$0 sm:$0xff] }
 0x528   :  { %v579_v53 = vpop.permute.xlu0 %578 }
 0x529   :  { %582 = vst.msk [vmem:[#allocation2] sm:$0xff] %vm581_vm4, %v579_v53 }
 0x52c   :  { %v752_v54 = vpop.permute.xlu1 %751 }
 0x52d   :  { %755 = vst.msk [vmem:[#allocation2] sm:$0xff] %vm754_vm5, %v752_v54 }
 0x530   :  { %v925_v55 = vpop.permute.xlu1 %924 }
 0x531   :  { %928 = vst.msk [vmem:[#allocation2] sm:$0xff] %vm927_vm6, %v925_v55 }
 0x538   :  { %v1612_v56 = vld [vmem:[#allocation2] sm:$0xff] }
 0x539   :  { %3973 = vmatprep.mubr.msk.f32.mxu0 %vm160_vm0, %v1612_v56 }
 0x565   :  { %v1265_v57 = vpop.permute.xlu0 %1264 }
 0x566   :  { %1267 = vst.msk [vmem:[#allocation2 + $0x8] sm:$0xff] %vm581_vm4, %v1265_v57 }
 0x569   :  { %v1437_v58 = vpop.permute.xlu0 %1436 }
 0x56a   :  { %1439 = vst.msk [vmem:[#allocation2 + $0x8] sm:$0xff] %vm754_vm5, %v1437_v58 }
 0x56d   :  { %v1609_v59 = vpop.permute.xlu1 %1608 }
 0x56e   :  { %1611 = vst.msk [vmem:[#allocation2 + $0x8] sm:$0xff] %vm927_vm6, %v1609_v59 }
 0x575   :  { %v1613_v60 = vld [vmem:[#allocation2 + $0x8] sm:$0xff] }
 0x576   :  { %3974 = vmatmul.mubr.msk.f32.vlgmr.msra.gmra.mrb[14].mxu0 %vm160_vm0, %v1613_v60 }
 0x577   :  { %4146 = vmatpush3.bf16.msra.mxu0 %v4143_v26 }
 0x578   :  { %4148 = vmatprep.subr.bf16.mxu0 %v4147_v28 }
 0x57b   :  { %4150 = vmatpush3.bf16.msra.mxu0 %v4147_v28 }
 0x57c   :  { %4008 = vmatprep.subr.mxu0 %v4429_v8 }
 0x649   :  { %v3975_v63 = vpop.f32.mrb[14].mxu0 }
 0x64a   :  { %v1703_v0 = vadd.f32 %v3975_v63, %v3716_v13  ;;  %v1697_v1 = vpop.f32.mrb[15].mxu0 }
 0x64b   :  { %v1698_v2 = vadd.f32 %v3716_v13, %v1697_v1 }
 0x64c   :  { %v1707_v3 = vadd.f32 %v1703_v0, %v4665_v7  ;;  %v4907_v7 = vadd.f32 %v3986_v61, %v3721_v10 }
 0x64d   :  { %v1706_v4 = vadd.f32 %v1698_v2, %v4661_v5 }
 0x64e   :  { %v1711_v6 = vsel %vm160_vm0, %v1707_v3, 0.0 }
 0x64f   :  { %1712 = vadd.xlane.f32.xlu1 %v1711_v6  ;;  %v1708_v9 = vsel %vm160_vm0, %v1706_v4, 0.0 }
 0x650   :  { %1709 = vadd.xlane.f32.xlu0 %v1708_v9 }
 0x660   :  { %1938 = vrot.lane.b32.xlu1 %v1837_v11, %s4432_s21 }
 0x664   :  { %2100 = vrot.lane.b32.xlu1 %v1837_v11, %s4431_s3 }
 0x668   :  { %2274 = vrot.lane.b32.xlu1 %v1837_v11, %s4433_s22 }
 0x66c   :  { %2445 = vrot.lane.b32.xlu1 %v1837_v11, %s4435_s10 }
 0x670   :  { %2615 = vrot.lane.b32.xlu1 %v4907_v7, %s4432_s21 }
 0x674   :  { %2777 = vrot.lane.b32.xlu1 %v4907_v7, %s4431_s3 }
 0x678   :  { %2949 = vrot.lane.b32.xlu1 %v4907_v7, %s4436_s0 }
 0x67c   :  { %3120 = vrot.lane.b32.xlu1 %v4907_v7, %s4437_s1 }
 0x6dc   :  { %v1713_v5 = vpop.xlane.xlu1 %1712 }
 0x6dd   :  { %v1716_v14 = vmul.f32 0.03125, %v1713_v5  ;;  %v1710_v15 = vpop.xlane.xlu0 %1709 }
 0x6de   :  { %v1715_v16 = vmul.f32 0.03125, %v1710_v15 }
 0x6df   :  { %v1718_v17 = vsub.f32 %v1707_v3, %v1716_v14 }
 0x6e0   :  { %v1717_v18 = vsub.f32 %v1706_v4, %v1715_v16  ;;  %v1939_v19 = vpop.permute.xlu1 %1938 }
 0x6e1   :  { %3999 = vmatpush3.xpose.msk.msra.mxu1 %vm245_vm2, %v1939_v19  ;;  %v1720_v22 = vmul.f32 %v1718_v17, %v1718_v17 }
 0x6e2   :  { %v1719_v20 = vmul.f32 %v1717_v18, %v1717_v18  ;;  %4003 = vmatprep.subr.mxu1 %v4429_v8 }
 0x6e3   :  { %v1724_v23 = vsel %vm160_vm0, %v1720_v22, 0.0 }
 0x6e4   :  { %4001 = vmatmul.mubr.msk.f32.vlgmr.msra.gmra.mrb[22].mxu1 %vm245_vm2, %v1837_v11  ;;  %v1721_v21 = vsel %vm160_vm0, %v1719_v20, 0.0  ;;  %v2101_v38 = vpop.permute.xlu1 %2100 }
 0x6e5   :  { %1722 = vadd.xlane.f32.xlu0 %v1721_v21  ;;  %4005 = vmatprep.mubr.msk.f32.mxu1 %vm4430_vm1, %v4429_v8 }
 0x6e8   :  { %v2275_v46 = vpop.permute.xlu1 %2274 }
 0x6e9   :  { %1725 = vadd.xlane.f32.xlu0 %v1724_v23 }
 0x6ec   :  { %v2446_v49 = vpop.permute.xlu1 %2445 }
 0x6f0   :  { %v2616_v51 = vpop.permute.xlu1 %2615 }
 0x6f4   :  { %v2778_v53 = vpop.permute.xlu1 %2777 }
 0x6f8   :  { %v2950_v55 = vpop.permute.xlu1 %2949 }
 0x6fc   :  { %v3121_v57 = vpop.permute.xlu1 %3120 }
 0x6ff   :  { %2102 = vrot.lane.b32.xlu0 %v1837_v11, %s4434_s4 }
 0x703   :  { %2272 = vrot.lane.b32.xlu0 %v1837_v11, %s4436_s0 }
 0x707   :  { %2443 = vrot.lane.b32.xlu0 %v1837_v11, %s4437_s1 }
 0x70b   :  { %2779 = vrot.lane.b32.xlu0 %v4907_v7, %s4434_s4 }
 0x70f   :  { %2951 = vrot.lane.b32.xlu0 %v4907_v7, %s4433_s22 }
 0x713   :  { %3122 = vrot.lane.b32.xlu0 %v4907_v7, %s4435_s10 }
 0x772   :  { %v1723_v29 = vpop.xlane.xlu0 %1722 }
 0x773   :  { %v1727_v30 = vmul.f32 0.03125, %v1723_v29 }
 0x775   :  { %v1729_v31 = vadd.f32 1e-06, %v1727_v30 }
 0x776   :  { %v1726_v32 = vpop.xlane.xlu0 %1725 }
 0x777   :  { %4238 = vrsqrt.f32 %v1729_v31  ;;  %v1728_v33 = vmul.f32 0.03125, %v1726_v32 }
 0x779   :  { %v1730_v34 = vadd.f32 1e-06, %v1728_v33 }
 0x77a   :  { %v2103_v43 = vpop.permute.xlu0 %2102 }
 0x77b   :  { %4240 = vrsqrt.f32 %v1730_v34 }
 0x77e   :  { %v2273_v48 = vpop.permute.xlu0 %2272 }
 0x781   :  { %v4239_v35 = vpop.eup %4238 }
 0x782   :  { %v1733_v37 = vmul.f32 %v4239_v35, %v1717_v18  ;;  %v2444_v50 = vpop.permute.xlu0 %2443 }
 0x784   :  { %v1742_v40 = vmul.f32 %v3719_v36, %v1733_v37 }
 0x785   :  { %v4241_v41 = vpop.eup %4240 }
 0x786   :  { %v1734_v42 = vmul.f32 %v4241_v41, %v1718_v17  ;;  %v4941_v44 = vadd.f32 %v3720_v39, %v1742_v40  ;;  %v2780_v52 = vpop.permute.xlu0 %2779 }
 0x788   :  { %v1743_v45 = vmul.f32 %v3719_v36, %v1734_v42  ;;  %3995 = vmatprep.mubr.msk.f32.mxu0 %vm160_vm0, %v4941_v44 }
 0x78a   :  { %v4945_v47 = vadd.f32 %v3720_v39, %v1743_v45  ;;  %v2952_v54 = vpop.permute.xlu0 %2951 }
 0x78c   :  { %3996 = vmatmul.mubr.msk.f32.vlgmr.msra.gmra.mrb[16].mxu0 %vm160_vm0, %v4945_v47 }
 0x78d   :  { %4009 = vmatpush3.xpose.msk.msra.mxu0 %vm245_vm2, %v2103_v43  ;;  %4010 = vmatprep.mubr.msk.f32.mxu0 %vm4430_vm1, %v4429_v8 }
 0x78e   :  { %4018 = vmatprep.subr.mxu0 %v4429_v8  ;;  %v3123_v56 = vpop.permute.xlu0 %3122 }
 0x790   :  { %4011 = vmatmul.mubr.msk.f32.vlgmr.msra.gmra.mrb[18].mxu0 %vm245_vm2, %v2101_v38 }
 0x791   :  { %4019 = vmatpush3.xpose.msk.msra.mxu0 %vm245_vm2, %v2275_v46  ;;  %4020 = vmatprep.mubr.msk.f32.mxu0 %vm4430_vm1, %v4429_v8 }
 0x792   :  { %4028 = vmatprep.subr.mxu0 %v4429_v8 }
 0x794   :  { %4021 = vmatmul.mubr.msk.f32.vlgmr.msra.gmra.mrb[20].mxu0 %vm245_vm2, %v2273_v48 }
 0x795   :  { %4029 = vmatpush3.xpose.msk.msra.mxu0 %vm245_vm2, %v2446_v49  ;;  %4030 = vmatprep.mubr.msk.f32.mxu0 %vm4430_vm1, %v4429_v8 }
 0x796   :  { %4038 = vmatprep.subr.mxu0 %v4429_v8 }
 0x798   :  { %4031 = vmatmul.mubr.msk.f32.vlgmr.msra.gmra.mrb[22].mxu0 %vm245_vm2, %v2444_v50 }
 0x799   :  { %4039 = vmatpush3.xpose.msk.msra.mxu0 %vm245_vm2, %v2616_v51  ;;  %4040 = vmatprep.mubr.msk.f32.mxu0 %vm4430_vm1, %v4429_v8 }
 0x79a   :  { %4048 = vmatprep.subr.mxu0 %v4429_v8 }
 0x79c   :  { %4041 = vmatmul.mubr.msk.f32.vlgmr.msra.gmra.mrb[24].mxu0 %vm245_vm2, %v4907_v7 }
 0x79d   :  { %4049 = vmatpush3.xpose.msk.msra.mxu0 %vm245_vm2, %v2780_v52  ;;  %4050 = vmatprep.mubr.msk.f32.mxu0 %vm4430_vm1, %v4429_v8 }
 0x79e   :  { %4058 = vmatprep.subr.mxu0 %v4429_v8 }
 0x7a0   :  { %4051 = vmatmul.mubr.msk.f32.vlgmr.msra.gmra.mrb[26].mxu0 %vm245_vm2, %v2778_v53 }
 0x7a1   :  { %4059 = vmatpush3.xpose.msk.msra.mxu0 %vm245_vm2, %v2952_v54  ;;  %4060 = vmatprep.mubr.msk.f32.mxu0 %vm4430_vm1, %v4429_v8 }
 0x7a2   :  { %4068 = vmatprep.subr.mxu0 %v4429_v8 }
 0x7a4   :  { %4061 = vmatmul.mubr.msk.f32.vlgmr.msra.gmra.mrb[28].mxu0 %vm245_vm2, %v2950_v55 }
 0x7a5   :  { %4069 = vmatpush3.xpose.msk.msra.mxu0 %vm245_vm2, %v3123_v56  ;;  %4070 = vmatprep.mubr.msk.f32.mxu0 %vm4430_vm1, %v4429_v8 }
 0x7a8   :  { %4071 = vmatmul.mubr.msk.f32.vlgmr.msra.gmra.mrb[30].mxu0 %vm245_vm2, %v3121_v57 }
 0x7b7   :  { %v2010_v58 = vpop.f32.mrb[22].mxu1 }
 0x7b8   :  { %v2014_v59 = vmul.f32 0.35355338, %v2010_v58  ;;  %v4002_v60 = vpop.f32.mrb[23].mxu1 }
 0x7ba   :  { %v2015_v61 = vsel %vm245_vm2, %v2014_v59, -inf }
 0x7bb   :  { %2016 = vmax.xlane.f32.xlu0 %v2015_v61 }
 0x848   :  { %v2017_v6 = vpop.xlane.xlu0 %2016 }
 0x849   :  { %v2018_v5 = vsub.f32 %v2014_v59, %v2017_v6 }
 0x84b   :  { %v2019_v18 = vmul.f32 1.442695, %v2018_v5 }
 0x84d   :  { %4242 = vpow2.f32 %v2019_v18 }
 0x857   :  { %v4243_v31 = vpop.eup %4242 }
 0x858   :  { %v2021_v36 = vsel %vm245_vm2, %v4243_v31, 0.0 }
 0x85f   :  { %v3997_v13 = vpop.f32.mrb[16].mxu0 }
 0x860   :  { %v4988_v63 = vadd.f32 %v3997_v13, %v3724_v62  ;;  %v1928_v0 = vpop.f32.mrb[17].mxu0 }
 0x861   :  { %v4990_v1 = vadd.f32 %v3724_v62, %v1928_v0 }
 0x863   :  { %4004 = vmatpush3.msra.mxu1 %v4990_v1  ;;  %v2174_v2 = vpop.f32.mrb[18].mxu0 }
 0x864   :  { %v2178_v3 = vmul.f32 0.35355338, %v2174_v2  ;;  %v4012_v4 = vpop.f32.mrb[19].mxu0  ;;  %4013 = vmatprep.subr.mxu1 %v4429_v8 }
 0x866   :  { %v2179_v9 = vsel %vm245_vm2, %v2178_v3, -inf }
 0x867   :  { %2180 = vmax.xlane.f32.xlu1 %v2179_v9  ;;  %v2346_v10 = vpop.f32.mrb[20].mxu0 }
 0x868   :  { %v2350_v11 = vmul.f32 0.35355338, %v2346_v10  ;;  %v4022_v7 = vpop.f32.mrb[21].mxu0 }
 0x86a   :  { %v2351_v14 = vsel %vm245_vm2, %v2350_v11, -inf }
 0x86b   :  { %2352 = vmax.xlane.f32.xlu0 %v2351_v14  ;;  %v2517_v15 = vpop.f32.mrb[22].mxu0 }
 0x86c   :  { %v2521_v16 = vmul.f32 0.35355338, %v2517_v15  ;;  %v4032_v17 = vpop.f32.mrb[23].mxu0 }
 0x86e   :  { %v2522_v19 = vsel %vm245_vm2, %v2521_v16, -inf }
 0x86f   :  { %2523 = vmax.xlane.f32.xlu0 %v2522_v19  ;;  %v2687_v20 = vpop.f32.mrb[24].mxu0 }
 0x870   :  { %v2691_v21 = vmul.f32 0.35355338, %v2687_v20  ;;  %v4042_v22 = vpop.f32.mrb[25].mxu0 }
 0x872   :  { %v2692_v23 = vsel %vm245_vm2, %v2691_v21, -inf }
 0x873   :  { %2693 = vmax.xlane.f32.xlu1 %v2692_v23  ;;  %v2851_v24 = vpop.f32.mrb[26].mxu0 }
 0x874   :  { %v2855_v25 = vmul.f32 0.35355338, %v2851_v24  ;;  %v4052_v26 = vpop.f32.mrb[27].mxu0 }
 0x876   :  { %v2856_v27 = vsel %vm245_vm2, %v2855_v25, -inf }
 0x877   :  { %2857 = vmax.xlane.f32.xlu0 %v2856_v27  ;;  %v3023_v12 = vpop.f32.mrb[28].mxu0 }
 0x878   :  { %v3027_v28 = vmul.f32 0.35355338, %v3023_v12  ;;  %v4062_v29 = vpop.f32.mrb[29].mxu0 }
 0x87a   :  { %v3028_v30 = vsel %vm245_vm2, %v3027_v28, -inf }
 0x87b   :  { %3029 = vmax.xlane.f32.xlu1 %v3028_v30  ;;  %v3194_v32 = vpop.f32.mrb[30].mxu0 }
 0x87c   :  { %v3198_v33 = vmul.f32 0.35355338, %v3194_v32  ;;  %v4072_v34 = vpop.f32.mrb[31].mxu0 }
 0x87e   :  { %v3199_v35 = vsel %vm245_vm2, %v3198_v33, -inf }
 0x87f   :  { %3200 = vmax.xlane.f32.xlu0 %v3199_v35  ;;  %2022 = vadd.xlane.f32.xlu1 %v2021_v36 }
 0x890   :  { %2191 = vrot.lane.b32.xlu1 %v4990_v1, %s4431_s3 }
 0x894   :  { %2533 = vrot.lane.b32.xlu1 %v4990_v1, %s4437_s1 }
 0x8f4   :  { %v2181_v37 = vpop.xlane.xlu1 %2180 }
 0x8f5   :  { %v2182_v38 = vsub.f32 %v2178_v3, %v2181_v37 }
 0x8f7   :  { %v2183_v39 = vmul.f32 1.442695, %v2182_v38 }
 0x8f8   :  { %v2353_v40 = vpop.xlane.xlu0 %2352 }
 0x8f9   :  { %4244 = vpow2.f32 %v2183_v39  ;;  %v2354_v41 = vsub.f32 %v2350_v11, %v2353_v40 }
 0x8fb   :  { %v2355_v42 = vmul.f32 1.442695, %v2354_v41 }
 0x8fc   :  { %v2524_v55 = vpop.xlane.xlu0 %2523 }
 0x8fd   :  { %4246 = vpow2.f32 %v2355_v42  ;;  %v2525_v56 = vsub.f32 %v2521_v16, %v2524_v55  ;;  %v3296_v55 = vld [vmem:[#allocation9 + $0x18] sm:$0xff] }
 0x8ff   :  { %v2526_v59 = vmul.f32 1.442695, %v2525_v56 }
 0x900   :  { %v2694_v45 = vpop.xlane.xlu1 %2693 }
 0x901   :  { %v2695_v58 = vsub.f32 %v2691_v21, %v2694_v45 }
 0x903   :  { %v4245_v43 = vpop.eup %4244  ;;  %v2696_v62 = vmul.f32 1.442695, %v2695_v58 }
 0x904   :  { %v2185_v46 = vsel %vm245_vm2, %v4245_v43, 0.0  ;;  %v2858_v57 = vpop.xlane.xlu0 %2857 }
 0x905   :  { %2186 = vadd.xlane.f32.xlu0 %v2185_v46  ;;  %v2859_v60 = vsub.f32 %v2855_v25, %v2858_v57 }
 0x907   :  { %v4247_v48 = vpop.eup %4246  ;;  %v2860_v0 = vmul.f32 1.442695, %v2859_v60 }
 0x908   :  { %v3030_v49 = vpop.xlane.xlu1 %3029  ;;  %v2357_v50 = vsel %vm245_vm2, %v4247_v48, 0.0 }
 0x909   :  { %2358 = vadd.xlane.f32.xlu1 %v2357_v50  ;;  %v3031_v13 = vsub.f32 %v3027_v28, %v3030_v49  ;;  %v3293_v50 = vld [vmem:[#allocation9] sm:$0xff] }
 0x90c   :  { %v2023_v51 = vpop.xlane.xlu1 %2022  ;;  %v3201_v61 = vpop.xlane.xlu0 %3200 }
 0x90d   :  { %4248 = vrcp.f32 %v2023_v51  ;;  %v3202_v2 = vsub.f32 %v3198_v33, %v3201_v61  ;;  %v3294_v51 = vld [vmem:[#allocation9 + $0x8] sm:$0xff] }
 0x90e   :  { %4250 = vpow2.f32 %v2526_v59 }
 0x90f   :  { %4252 = vpow2.f32 %v2696_v62  ;;  %v3203_v3 = vmul.f32 1.442695, %v3202_v2 }
 0x910   :  { %v2192_v54 = vpop.permute.xlu1 %2191  ;;  %4254 = vpow2.f32 %v2860_v0 }
 0x914   :  { %v2534_v17 = vpop.permute.xlu1 %2533 }
 0x917   :  { %v4249_v52 = vpop.eup %4248 }
 0x918   :  { %v2025_v53 = vmul.f32 %v4249_v52, %v4243_v31  ;;  %v4251_v4 = vpop.eup %4250 }
 0x919   :  { %v4253_v6 = vpop.eup %4252  ;;  %v2528_v9 = vsel %vm245_vm2, %v4251_v4, 0.0 }
 0x91a   :  { %2868 = vrot.lane.b32.xlu1 %v4988_v63, %s4431_s3  ;;  %4006 = vmatmul.mubr.msk.f32.vlgmr.msra.gmra.mrb[24].mxu1 %vm245_vm2, %v2025_v53  ;;  %v4255_v10 = vpop.eup %4254  ;;  %v2698_v7 = vsel %vm245_vm2, %v4253_v6, 0.0  ;;  %v4151_v53 = vpack.c.bf16 %v3294_v51, %v3293_v50  ;;  %v3755_v51 = vld [vmem:[%s5159_s15] ss:$0 sm:$0xff] }
 0x91b   :  { %2362 = vrot.lane.b32.xlu0 %v4990_v1, %s4436_s0  ;;  %4014 = vmatpush3.msra.mxu1 %v2192_v54  ;;  %v3032_v1 = vmul.f32 1.442695, %v3031_v13  ;;  %v2862_v5 = vsel %vm245_vm2, %v4255_v10, 0.0  ;;  %v3295_v54 = vld [vmem:[#allocation9 + $0x10] sm:$0xff] }
 0x91c   :  { %4015 = vmatprep.mubr.msk.f32.mxu1 %vm4430_vm1, %v4429_v8  ;;  %4023 = vmatprep.subr.mxu1 %v4429_v8  ;;  %v4155_v57 = vpack.c.bf16 %v3296_v55, %v3295_v54 }
 0x91d   :  { %4256 = vpow2.f32 %v3032_v1  ;;  %4152 = vmatprep.subr.bf16.mxu0 %v4151_v53 }
 0x91e   :  { %4258 = vpow2.f32 %v3203_v3  ;;  %4154 = vmatpush3.bf16.msra.mxu0 %v4151_v53 }
 0x91f   :  { %4156 = vmatprep.subr.bf16.mxu0 %v4155_v57 }
 0x922   :  { %4158 = vmatpush3.bf16.msra.mxu0 %v4155_v57 }
 0x927   :  { %v4257_v11 = vpop.eup %4256 }
 0x928   :  { %v5019_v14 = vpop.eup %4258  ;;  %v3034_v15 = vsel %vm245_vm2, %v4257_v11, 0.0 }
 0x929   :  { %v3205_v16 = vsel %vm245_vm2, %v5019_v14, 0.0 }
 0x93a   :  { %2529 = vadd.xlane.f32.xlu0 %v2528_v9 }
 0x93e   :  { %2699 = vadd.xlane.f32.xlu1 %v2698_v7  ;;  %2863 = vadd.xlane.f32.xlu0 %v2862_v5 }
 0x942   :  { %3035 = vadd.xlane.f32.xlu1 %v3034_v15  ;;  %3206 = vadd.xlane.f32.xlu0 %v3205_v16 }
 0x953   :  { %3210 = vrot.lane.b32.xlu1 %v4988_v63, %s4437_s1 }
 0x958   :  { %3039 = vrot.lane.b32.xlu0 %v4988_v63, %s4436_s0  ;;  %s4444_s0 = smov [#allocation12]  }
 0x959   :  { %s3675_s1 = sshll.u32 %s4444_s0, 4  ;;  %s3676_s1 = int_to_ptr.vmem [resolvable:$true] %s3675_s1 }
 0x95a   :  { %p4397_p13 = scmp.lt.s32.totalorder %s3676_s1, %s3676_s1 }
 0x992   :  { %v2187_v18 = vpop.xlane.xlu0 %2186 }
 0x993   :  { %4260 = vrcp.f32 %v2187_v18 }
 0x996   :  { %v2359_v19 = vpop.xlane.xlu1 %2358  ;;  %v2363_v22 = vpop.permute.xlu0 %2362 }
 0x997   :  { %4262 = vrcp.f32 %v2359_v19 }
 0x99a   :  { %v2869_v25 = vpop.permute.xlu1 %2868 }
 0x99d   :  { %v4261_v20 = vpop.eup %4260 }
 0x99e   :  { %v2189_v21 = vmul.f32 %v4261_v20, %v4245_v43 }
 0x9a0   :  { %4016 = vmatmul.mubr.msk.f32.vlgmr.msra.gmra.mrb[26].mxu1 %vm245_vm2, %v2189_v21 }
 0x9a1   :  { %v4263_v23 = vpop.eup %4262  ;;  %4024 = vmatpush3.msra.mxu1 %v2363_v22  ;;  %4025 = vmatprep.mubr.msk.f32.mxu1 %vm4430_vm1, %v4429_v8 }
 0x9a2   :  { %v2361_v24 = vmul.f32 %v4263_v23, %v4247_v48  ;;  %4033 = vmatprep.subr.mxu1 %v4429_v8 }
 0x9a4   :  { %4026 = vmatmul.mubr.msk.f32.vlgmr.msra.gmra.mrb[28].mxu1 %vm245_vm2, %v2361_v24 }
 0x9a5   :  { %4034 = vmatpush3.msra.mxu1 %v2534_v17  ;;  %4035 = vmatprep.mubr.msk.f32.mxu1 %vm4430_vm1, %v4429_v8 }
 0x9a6   :  { %4043 = vmatprep.subr.mxu1 %v4429_v8 }
 0x9c7   :  { %v2530_v26 = vpop.xlane.xlu0 %2529 }
 0x9c8   :  { %4264 = vrcp.f32 %v2530_v26 }
 0x9cb   :  { %v2700_v27 = vpop.xlane.xlu1 %2699  ;;  %v2864_v12 = vpop.xlane.xlu0 %2863 }
 0x9cc   :  { %4266 = vrcp.f32 %v2700_v27 }
 0x9cd   :  { %4268 = vrcp.f32 %v2864_v12 }
 0x9cf   :  { %v3036_v28 = vpop.xlane.xlu1 %3035  ;;  %v3207_v31 = vpop.xlane.xlu0 %3206 }
 0x9d0   :  { %4270 = vrcp.f32 %v3036_v28  ;;  %v3432_v28 = vld [vmem:[#allocation11 + $0x8] sm:$0xff] }
 0x9d1   :  { %4272 = vrcp.f32 %v3207_v31  ;;  %v3434_v31 = vld [vmem:[#allocation11 + $0x18] sm:$0xff] }
 0x9d2   :  { %v4265_v29 = vpop.eup %4264 }
 0x9d3   :  { %v2532_v30 = vmul.f32 %v4265_v29, %v4251_v4  ;;  %v3040_v37 = vpop.permute.xlu0 %3039  ;;  %v3211_v39 = vpop.permute.xlu1 %3210 }
 0x9d5   :  { %4036 = vmatmul.mubr.msk.f32.vlgmr.msra.gmra.mrb[30].mxu1 %vm245_vm2, %v2532_v30  ;;  %v3433_v30 = vld [vmem:[#allocation11 + $0x10] sm:$0xff] }
 0x9d6   :  { %v4267_v32 = vpop.eup %4266  ;;  %4044 = vmatpush3.msra.mxu1 %v4988_v63  ;;  %4045 = vmatprep.mubr.msk.f32.mxu1 %vm4430_vm1, %v4429_v8 }
 0x9d7   :  { %v2702_v33 = vmul.f32 %v4267_v32, %v4253_v6  ;;  %4053 = vmatprep.subr.mxu1 %v4429_v8  ;;  %v4269_v34 = vpop.eup %4268  ;;  %v4163_v32 = vpack.c.bf16 %v3434_v31, %v3433_v30  ;;  %v3762_v30 = vld [vmem:[%s5164_s20] ss:$0 sm:$0xff] }
 0x9d8   :  { %v2866_v35 = vmul.f32 %v4269_v34, %v4255_v10  ;;  %v3526_v34 = vld [vmem:[%s5162_s18 + $0x8] sm:$0xff] }
 0x9d9   :  { %4046 = vmatmul.mubr.msk.f32.vlgmr.msra.gmra.mrb[32].mxu1 %vm245_vm2, %v2702_v33  ;;  %v3525_v33 = vld [vmem:[%s5162_s18] sm:$0xff] }
 0x9da   :  { %4054 = vmatpush3.msra.mxu1 %v2869_v25  ;;  %4055 = vmatprep.mubr.msk.f32.mxu1 %vm4430_vm1, %v4429_v8  ;;  %v4271_v36 = vpop.eup %4270 }
 0x9db   :  { %4063 = vmatprep.subr.mxu1 %v4429_v8  ;;  %v3038_v63 = vmul.f32 %v4271_v36, %v4257_v11  ;;  %v4273_v38 = vpop.eup %4272  ;;  %v3751_v11 = vld [vmem:[%s5157_s13] ss:$0 sm:$0xff]  ;;  %v4167_v36 = vpack.c.bf16 %v3526_v34, %v3525_v33  ;;  %s5190_s13 = sld [smem:[#allocation24_spill]] }
 0x9dc   :  { %v3209_v40 = vmul.f32 %v4273_v38, %v5019_v14  ;;  %v3529_v38 = vld [vmem:[%s5162_s18 + $0x20] sm:$0xff] }
 0x9dd   :  { %4056 = vmatmul.mubr.msk.f32.vlgmr.msra.gmra.mrb[34].mxu1 %vm245_vm2, %v2866_v35  ;;  %v3527_v35 = vld [vmem:[%s5162_s18 + $0x10] sm:$0xff]  ;;  %4168 = vmatprep.subr.bf16.mxu0 %v4167_v36 }
 0x9de   :  { %4064 = vmatpush3.msra.mxu1 %v3040_v37  ;;  %4065 = vmatprep.mubr.msk.f32.mxu1 %vm4430_vm1, %v4429_v8  ;;  %v3528_v37 = vld [vmem:[%s5162_s18 + $0x18] sm:$0xff] }
 0x9df   :  { %4073 = vmatprep.subr.mxu1 %v4429_v8 }
 0x9e1   :  { %4066 = vmatmul.mubr.msk.f32.vlgmr.msra.gmra.mrb[36].mxu1 %vm245_vm2, %v3038_v63  ;;  %v4171_v63 = vpack.c.bf16 %v3528_v37, %v3527_v35  ;;  %v3763_v34 = vld [vmem:[%s5190_s13] ss:$0 sm:$0xff] }
 0x9e2   :  { %4074 = vmatpush3.msra.mxu1 %v3211_v39  ;;  %4075 = vmatprep.mubr.msk.f32.mxu1 %vm4430_vm1, %v4429_v8  ;;  %v3530_v39 = vld [vmem:[%s5162_s18 + $0x28] sm:$0xff] }
 0x9e5   :  { %4076 = vmatmul.mubr.msk.f32.vlgmr.msra.gmra.mrb[38].mxu1 %vm245_vm2, %v3209_v40  ;;  %v4175_v40 = vpack.c.bf16 %v3530_v39, %v3529_v38 }
 0x9ed   :  { %v2095_v41 = vpop.f32.mrb[24].mxu1 }
 0x9ee   :  { %2099 = vst.msk [vmem:[#allocation2] sm:$0xff] %vm245_vm2, %v2095_v41  ;;  %v4007_v42 = vpop.f32.mrb[25].mxu1 }
 0xa73   :  { %v2263_v43 = vpop.f32.mrb[26].mxu1 }
 0xa74   :  { %2268 = vrot.lane.b32.xlu0 %v2263_v43, %s4425_s27  ;;  %v4017_v45 = vpop.f32.mrb[27].mxu1 }
 0xa77   :  { %v2434_v46 = vpop.f32.mrb[28].mxu1 }
 0xa78   :  { %2439 = vrot.lane.b32.xlu1 %v2434_v46, %s4442_s25  ;;  %v4027_v48 = vpop.f32.mrb[29].mxu1 }
 0xaa8   :  { %v2605_v49 = vpop.f32.mrb[30].mxu1 }
 0xaa9   :  { %2610 = vrot.lane.b32.xlu1 %v2605_v49, %s4443_s12  ;;  %v4037_v8 = vpop.f32.mrb[31].mxu1 }
 0xaaa   :  { %v3754_v8 = vld [vmem:[%s5158_s14] ss:$0 sm:$0xff] }
 0xaac   :  { %v2772_v52 = vpop.f32.mrb[32].mxu1 }
 0xaad   :  { %2776 = vst.msk [vmem:[#allocation2 + $0x8] sm:$0xff] %vm245_vm2, %v2772_v52  ;;  %v4047_v56 = vpop.f32.mrb[33].mxu1 }
 0xab0   :  { %v2940_v58 = vpop.f32.mrb[34].mxu1 }
 0xab1   :  { %2945 = vrot.lane.b32.xlu0 %v2940_v58, %s4425_s27  ;;  %v4057_v59 = vpop.f32.mrb[35].mxu1  ;;  %v3531_v58 = vld [vmem:[%s5162_s18 + $0x30] sm:$0xff] }
 0xab2   :  { %v3532_v59 = vld [vmem:[%s5162_s18 + $0x38] sm:$0xff] }
 0xab4   :  { %v3111_v60 = vpop.f32.mrb[36].mxu1 }
 0xab5   :  { %3116 = vrot.lane.b32.xlu0 %v3111_v60, %s4442_s25  ;;  %v4067_v61 = vpop.f32.mrb[37].mxu1  ;;  %v4179_v60 = vpack.c.bf16 %v3532_v59, %v3531_v58  ;;  %s4392_s25 = scalar_lea.vmem %s3676_s1, 256 }
 0xab6   :  { %v3756_v61 = vld [vmem:[%s5161_s17] ss:$0 sm:$0xff]  ;;  %p4393_p12 = scmp.ne.s32.totalorder %s3676_s1, %s4392_s25  ;;  %p4398_p0 = scmp.lt.s32.totalorder %s4392_s25, %s4392_s25 }
 0xab8   :  { %v3282_v62 = vpop.f32.mrb[38].mxu1  ;;  %p4399_p1 = por %p4398_p0, %p4397_p13 }
 0xab9   :  { %3287 = vrot.lane.b32.xlu1 %v3282_v62, %s4443_s12  ;;  %v4077_v13 = vpop.f32.mrb[39].mxu1 }
 0xaba   :  { %p4400_p2 = pnand %p4399_p1, %p4393_p12 }
 0xae6   :  { %v2269_v0 = vpop.permute.xlu0 %2268 }
 0xae7   :  { %2271 = vst.msk [vmem:[#allocation2] sm:$0xff] %vm581_vm4, %v2269_v0 }
 0xaea   :  { %v2440_v2 = vpop.permute.xlu1 %2439 }
 0xaeb   :  { %2442 = vst.msk [vmem:[#allocation2] sm:$0xff] %vm754_vm5, %v2440_v2 }
 0xb1b   :  { %v2611_v1 = vpop.permute.xlu1 %2610 }
 0xb1c   :  { %2613 = vst.msk [vmem:[#allocation2] sm:$0xff] %vm927_vm6, %v2611_v1 }
 0xb23   :  { %v2946_v3 = vpop.permute.xlu0 %2945  ;;  %v3291_v4 = vld [vmem:[#allocation2] sm:$0xff] }
 0xb24   :  { %2948 = vst.msk [vmem:[#allocation2 + $0x8] sm:$0xff] %vm581_vm4, %v2946_v3  ;;  %4086 = vmatprep.mubr.msk.f32.mxu0 %vm160_vm0, %v3291_v4  ;;  %v3759_v4 = vld [vmem:[%s5163_s19] ss:$0 sm:$0xff] }
 0xb27   :  { %v3117_v6 = vpop.permute.xlu0 %3116 }
 0xb28   :  { %3119 = vst.msk [vmem:[#allocation2 + $0x8] sm:$0xff] %vm754_vm5, %v3117_v6 }
 0xb2b   :  { %v3288_v9 = vpop.permute.xlu1 %3287 }
 0xb2c   :  { %3290 = vst.msk [vmem:[#allocation2 + $0x8] sm:$0xff] %vm927_vm6, %v3288_v9 }
 0xb33   :  { %v3292_v10 = vld [vmem:[#allocation2 + $0x8] sm:$0xff] }
 0xb34   :  { %4087 = vmatmul.mubr.msk.f32.vlgmr.msra.gmra.mrb[32].mxu0 %vm160_vm0, %v3292_v10 }
 0xb35   :  { %4170 = vmatpush3.bf16.msra.mxu0 %v4167_v36 }
 0xb36   :  { %4172 = vmatprep.subr.bf16.mxu0 %v4171_v63 }
 0xb39   :  { %4174 = vmatpush3.bf16.msra.mxu0 %v4171_v63 }
 0xb3a   :  { %4176 = vmatprep.subr.bf16.mxu0 %v4175_v40 }
 0xb3d   :  { %4178 = vmatpush3.bf16.msra.mxu0 %v4175_v40 }
 0xb3e   :  { %4180 = vmatprep.subr.bf16.mxu0 %v4179_v60 }
 0xb41   :  { %4182 = vmatpush3.bf16.msra.mxu0 %v4179_v60 }
 0xc07   :  { %v4088_v7 = vpop.f32.mrb[32].mxu0 }
 0xc08   :  { %v3382_v5 = vadd.f32 %v4088_v7, %v3751_v11  ;;  %v3376_v14 = vpop.f32.mrb[33].mxu0 }
 0xc09   :  { %v3377_v15 = vadd.f32 %v3751_v11, %v3376_v14 }
 0xc0a   :  { %v3386_v16 = vadd.f32 %v3382_v5, %v4945_v47 }
 0xc0b   :  { %v3385_v17 = vadd.f32 %v3377_v15, %v4941_v44  ;;  %v3431_v44 = vld [vmem:[#allocation11] sm:$0xff] }
 0xc0c   :  { %v3390_v18 = vsel %vm160_vm0, %v3386_v16, 0.0  ;;  %v4159_v29 = vpack.c.bf16 %v3432_v28, %v3431_v44 }
 0xc0d   :  { %3391 = vadd.xlane.f32.xlu1 %v3390_v18  ;;  %v3387_v19 = vsel %vm160_vm0, %v3385_v17, 0.0 }
 0xc0e   :  { %3388 = vadd.xlane.f32.xlu0 %v3387_v19  ;;  %4160 = vmatprep.subr.bf16.mxu1 %v4159_v29 }
 0xc0f   :  { %4162 = vmatpush3.bf16.msra.mxu1 %v4159_v29 }
 0xc10   :  { %4164 = vmatprep.subr.bf16.mxu1 %v4163_v32 }
 0xc13   :  { %4166 = vmatpush3.bf16.msra.mxu1 %v4163_v32 }
 0xc9a   :  { %v3392_v20 = vpop.xlane.xlu1 %3391 }
 0xc9b   :  { %v3394_v21 = vmul.f32 0.03125, %v3392_v20  ;;  %v3389_v22 = vpop.xlane.xlu0 %3388 }
 0xc9c   :  { %v3393_v23 = vmul.f32 0.03125, %v3389_v22 }
 0xc9d   :  { %v3396_v24 = vsub.f32 %v3386_v16, %v3394_v21 }
 0xc9e   :  { %v3395_v25 = vsub.f32 %v3385_v17, %v3393_v23 }
 0xc9f   :  { %v3398_v12 = vmul.f32 %v3396_v24, %v3396_v24 }
 0xca0   :  { %v3397_v26 = vmul.f32 %v3395_v25, %v3395_v25 }
 0xca1   :  { %v3402_v47 = vsel %vm160_vm0, %v3398_v12, 0.0 }
 0xca2   :  { %v3399_v27 = vsel %vm160_vm0, %v3397_v26, 0.0 }
 0xca3   :  { %3400 = vadd.xlane.f32.xlu0 %v3399_v27 }
 0xca7   :  { %3403 = vadd.xlane.f32.xlu0 %v3402_v47 }
 0xd30   :  { %v3401_v41 = vpop.xlane.xlu0 %3400 }
 0xd31   :  { %v3405_v42 = vmul.f32 0.03125, %v3401_v41 }
 0xd33   :  { %v3407_v43 = vadd.f32 1e-06, %v3405_v42 }
 0xd34   :  { %v3404_v45 = vpop.xlane.xlu0 %3403 }
 0xd35   :  { %4274 = vrsqrt.f32 %v3407_v43  ;;  %v3406_v46 = vmul.f32 0.03125, %v3404_v45 }
 0xd37   :  { %v3408_v48 = vadd.f32 1e-06, %v3406_v46 }
 0xd39   :  { %4276 = vrsqrt.f32 %v3408_v48 }
 0xd3f   :  { %v4275_v49 = vpop.eup %4274 }
 0xd40   :  { %v3411_v50 = vmul.f32 %v4275_v49, %v3395_v25 }
 0xd42   :  { %v3420_v52 = vmul.f32 %v3754_v8, %v3411_v50 }
 0xd43   :  { %v4277_v53 = vpop.eup %4276 }
 0xd44   :  { %v3412_v54 = vmul.f32 %v4277_v53, %v3396_v24  ;;  %v3429_v55 = vadd.f32 %v3755_v51, %v3420_v52 }
 0xd46   :  { %v3421_v56 = vmul.f32 %v3754_v8, %v3412_v54  ;;  %4097 = vmatprep.mubr.msk.f32.mxu1 %vm160_vm0, %v3429_v55 }
 0xd48   :  { %v3430_v57 = vadd.f32 %v3755_v51, %v3421_v56 }
 0xd4a   :  { %4098 = vmatmul.mubr.msk.f32.vlgmr.msra.gmra.mrb[40].mxu1 %vm160_vm0, %v3430_v57 }
 0xe1d   :  { %v4099_v62 = vpop.f32.mrb[40].mxu1 }
 0xe1e   :  { %v3520_v13 = vadd.f32 %v4099_v62, %v3756_v61  ;;  %v3514_v0 = vpop.f32.mrb[41].mxu1 }
 0xe1f   :  { %v3515_v2 = vadd.f32 %v3756_v61, %v3514_v0 }
 0xe20   :  { %v3524_v3 = vmax.f32 %v3520_v13, 0.0 }
 0xe21   :  { %v3523_v1 = vmax.f32 %v3515_v2, 0.0 }
 0xe23   :  { %4116 = vmatprep.mubr.msk.f32.mxu0 %vm3540_vm7, %v3523_v1 }
 0xe24   :  { %4117 = vmatmul.mubr.msk.f32.vlgmr.msra.gmra.mrb[34].mxu0 %vm3540_vm7, %v3524_v3 }
 0xef7   :  { %v4118_v6 = vpop.f32.mrb[34].mxu0 }
 0xef8   :  { %v3619_v9 = vadd.f32 %v4118_v6, %v3759_v4  ;;  %v3613_v10 = vpop.f32.mrb[35].mxu0 }
 0xef9   :  { %v3614_v11 = vadd.f32 %v3759_v4, %v3613_v10 }
 0xefa   :  { %v3623_v7 = vadd.f32 %v3619_v9, %v3430_v57 }
 0xefb   :  { %v3622_v5 = vadd.f32 %v3614_v11, %v3429_v55 }
 0xefc   :  { %v3627_v14 = vsel %vm160_vm0, %v3623_v7, 0.0 }
 0xefd   :  { %3628 = vadd.xlane.f32.xlu0 %v3627_v14  ;;  %v3624_v15 = vsel %vm160_vm0, %v3622_v5, 0.0 }
 0xefe   :  { %3625 = vadd.xlane.f32.xlu1 %v3624_v15 }
 0xf8a   :  { %v3629_v16 = vpop.xlane.xlu0 %3628 }
 0xf8b   :  { %v3631_v17 = vmul.f32 0.03125, %v3629_v16  ;;  %v3626_v18 = vpop.xlane.xlu1 %3625 }
 0xf8c   :  { %v3630_v19 = vmul.f32 0.03125, %v3626_v18 }
 0xf8d   :  { %v3633_v20 = vsub.f32 %v3623_v7, %v3631_v17 }
 0xf8e   :  { %v3632_v21 = vsub.f32 %v3622_v5, %v3630_v19 }
 0xf8f   :  { %v3635_v22 = vmul.f32 %v3633_v20, %v3633_v20 }
 0xf90   :  { %v3634_v23 = vmul.f32 %v3632_v21, %v3632_v21 }
 0xf91   :  { %v3639_v24 = vsel %vm160_vm0, %v3635_v22, 0.0 }
 0xf92   :  { %3640 = vadd.xlane.f32.xlu0 %v3639_v24  ;;  %v3636_v25 = vsel %vm160_vm0, %v3634_v23, 0.0 }
 0xf93   :  { %3637 = vadd.xlane.f32.xlu1 %v3636_v25 }
0x101f   :  { %v3641_v26 = vpop.xlane.xlu0 %3640 }
0x1020   :  { %v3643_v27 = vmul.f32 0.03125, %v3641_v26  ;;  %v3638_v12 = vpop.xlane.xlu1 %3637 }
0x1021   :  { %v3642_v47 = vmul.f32 0.03125, %v3638_v12 }
0x1022   :  { %v3645_v44 = vadd.f32 1e-06, %v3643_v27 }
0x1023   :  { %v3644_v28 = vadd.f32 1e-06, %v3642_v47 }
0x1024   :  { %4278 = vrsqrt.f32 %v3645_v44 }
0x1025   :  { %4280 = vrsqrt.f32 %v3644_v28 }
0x102e   :  { %v4279_v29 = vpop.eup %4278 }
0x102f   :  { %v4281_v31 = vpop.eup %4280  ;;  %v3649_v32 = vmul.f32 %v4279_v29, %v3633_v20 }
0x1030   :  { %v3648_v33 = vmul.f32 %v4281_v31, %v3632_v21 }
0x1031   :  { %v3658_v35 = vmul.f32 %v3762_v30, %v3649_v32 }
0x1032   :  { %v3657_v36 = vmul.f32 %v3762_v30, %v3648_v33 }
0x1033   :  { %v3667_v37 = vadd.f32 %v3763_v34, %v3658_v35 }
0x1034   :  { %v3666_v63 = vadd.f32 %v3763_v34, %v3657_v36 }
0x1035   :  { %3669 = vst.msk [vmem:[#allocation12 + $0x8] sm:$0xff] %vm160_vm0, %v3667_v37 }
0x1036   :  { %3668 = vst.msk [vmem:[#allocation12] sm:$0xff] %vm160_vm0, %v3666_v63 }
0x1037   :  { %4403 = shalt.err (!%p4400_p2)
}
0x1038   :  { %s5191_s5 = sld [smem:[#allocation25_spill]] }
0x103e   :  { %s4404_s30 = scalar_lea.hbm %s5191_s5, 256 }
0x103f   :  { %p4405_p3 = scmp.ne.s32.totalorder %s5191_s5, %s4404_s30  ;;  %p4408_p4 = scmp.lt.u32.totalorder %s4404_s30, %s5191_s5 }
0x1041   :  { %p4410_p5 = pnand %p4408_p4, %p4405_p3 }
0x1043   :  { %4413 = shalt.err (!%p4410_p5)
}
0x1044   :  { %3681 = dma.vmem_to_hbm [thread:$0]  %s3676_s1, 256, %s5191_s5, [#allocation5], %s4424_s2, %s4424_s2, %s4425_s27  }
0x1045   :  { %4420 = dma.done.wait [#allocation5], 256  }
0x1046   :  { %4421 = vsyncadd [#allocation5], 4294967040 }
0x1047   :  { %3685 = vsyncpa [#allocation4], 1 }
0x1048   :  { %3686 = vsyncpa [#allocation7], 1 }
0x1049   :  { %3687 = vsyncpa [#allocation10], 1 }
0x104a   :  { %3688 = vsyncpa [#allocation5], 1 }

</bundles_post_ra>
